<compile_context>
chip_gen: v7x
topology: tpu7x:2x2x1
jax: 0.10.0
libtpu: 0.0.40
codegen_flags: <defaults>
</compile_context>

<pallas_src>
import functools

import jax
import jax.numpy as jnp
from jax.experimental import pallas as pl
from jax.experimental.pallas import tpu as pltpu


NEG_SLOPE = 0.01  # torch.nn.LeakyReLU default


def _leaky_relu(x):
    return jnp.where(x > 0, x, NEG_SLOPE * x)


# --------------------------------------------------------------------------- #
# Kernel
# --------------------------------------------------------------------------- #
def quantile_encoder_kernel(s_ref, rt_ref,
                            w1s_ref, w1r_ref, w1t_ref, b1_ref,
                            w2_ref, b2_ref, w3_ref, b3_ref,
                            o_ref):
    # ---- Layer 1: fused concat.  MXU matmul for the state columns, two f32
    # rank-1 VPU updates for [return_to_go | timestep], then bias + LeakyReLU.
    rt = rt_ref[...]                                       # (TM, 2) f32
    h = jnp.dot(s_ref[...].astype(jnp.bfloat16), w1s_ref[...],
                preferred_element_type=jnp.float32)
    h = h + rt[:, 0:1] * w1r_ref[...] + rt[:, 1:2] * w1t_ref[...]
    h = _leaky_relu(h + b1_ref[...])

    # ---- Layer 2: Linear + LeakyReLU
    h = jnp.dot(h.astype(jnp.bfloat16), w2_ref[...],
                preferred_element_type=jnp.float32)
    h = _leaky_relu(h + b2_ref[...])

    # ---- Layer 3: w3 is column-padded to a 128-lane MXU tile; only the real
    # out_dim columns are stored, so HBM writeback is 16x smaller than a
    # zero-padded (TM, 128) f32 store.
    y = jnp.dot(h.astype(jnp.bfloat16), w3_ref[...],
                preferred_element_type=jnp.float32)
    out_dim = o_ref.shape[-1]
    o_ref[...] = (y[:, :out_dim] + b3_ref[...]).astype(o_ref.dtype)


# --------------------------------------------------------------------------- #
# Parameter preparation (one-time, outside the per-call wrapper)
# --------------------------------------------------------------------------- #
def prepare_params(params, state_dim):
    """Split w1 across [state | rtg | timestep] (module concat order), cast
    matmul weights to bf16, and column-pad w3 to a 128-lane MXU tile."""
    w1, b1, w2, b2, w3, b3 = params
    assert w1.shape[0] == state_dim + 2, (
        "w1 rows must be ordered [state | return_to_go | timestep]")
    out_dim = w3.shape[1]
    out_mxu = pl.cdiv(out_dim, 128) * 128
    pad = out_mxu - out_dim

    w1s = w1[:state_dim, :].astype(jnp.bfloat16)                 # MXU block
    w1r = w1[state_dim:state_dim + 1, :].astype(jnp.float32)     # VPU rank-1
    w1t = w1[state_dim + 1:state_dim + 2, :].astype(jnp.float32)
    w3p = jnp.pad(w3, ((0, 0), (0, pad))).astype(jnp.bfloat16)

    prepped = (w1s, w1r, w1t,
               jnp.reshape(b1, (1, -1)).astype(jnp.float32),
               w2.astype(jnp.bfloat16),
               jnp.reshape(b2, (1, -1)).astype(jnp.float32),
               w3p,
               jnp.reshape(b3, (1, -1)).astype(jnp.float32))
    return prepped, out_dim


def _choose_tm(batch):
    """Batch tile size.
      * batch >= 512: largest 128-multiple tile (capped at 2048) that still
        leaves >= 4 grid tiles -> >= 2 tiles per TensorCore on v7x megacore
        while amortizing per-grid-step overhead at large batch.
      * 256 <= batch < 512: 128 (>= 2 tiles for intra-core pipelining).
      * small batch: one 8-aligned tile.
    """
    if batch >= 512:
        tm = (batch // 4) // 128 * 128
        return int(max(128, min(2048, tm)))
    if batch >= 256:
        return 128
    return int(max(8, pl.cdiv(batch, 8) * 8))


# --------------------------------------------------------------------------- #
# Wrapper
# --------------------------------------------------------------------------- #
def quantile_encoder_forward(state, return_to_go, timestep, prepped, out_dim,
                             *, tm=None):
    w1s, w1r, w1t, b1, w2, b2, w3p, b3 = prepped
    batch, state_dim = state.shape
    h1 = w1s.shape[1]
    h2 = w2.shape[1]
    out_mxu = w3p.shape[1]

    # Pack the two width-1 inputs into one (B, 2) operand -> single DMA/spec.
    rt = jnp.concatenate([return_to_go, timestep], axis=-1).astype(jnp.float32)

    if tm is None:
        tm = _choose_tm(batch)
    grid = (pl.cdiv(batch, tm),)   # ragged last block handled by edge masking

    def batched(width):
        return pl.BlockSpec((tm, width), lambda i: (i, 0))

    def resident(arr):
        # Constant block index => fetched once, stays resident in VMEM.
        return pl.BlockSpec(arr.shape, lambda i: (0, 0))

    flops = 2 * batch * (state_dim * h1 + h1 * h2 + h2 * out_mxu) + 4 * batch * h1
    bytes_accessed = (
        4 * batch * (state_dim + 2)                       # f32 activations in
        + 4 * batch * out_dim                             # f32 output (real width)
        + 2 * (w1s.size + w2.size + w3p.size)             # bf16 weights
        + 4 * (w1r.size + w1t.size + b1.size + b2.size + b3.size))

    out = pl.pallas_call(
        quantile_encoder_kernel,
        out_shape=jax.ShapeDtypeStruct((batch, out_dim), jnp.float32),
        grid_spec=pltpu.PrefetchScalarGridSpec(
            num_scalar_prefetch=0,
            grid=grid,
            in_specs=[
                batched(state_dim), batched(2),
                resident(w1s), resident(w1r), resident(w1t), resident(b1),
                resident(w2), resident(b2),
                resident(w3p), resident(b3),
            ],
            out_specs=batched(out_dim),
        ),
        compiler_params=pltpu.CompilerParams(
            dimension_semantics=("parallel",)),
        cost_estimate=pl.CostEstimate(
            flops=flops, transcendentals=0, bytes_accessed=bytes_accessed),
    )(state, rt, w1s, w1r, w1t, b1, w2, b2, w3p, b3)

    return out


# --------------------------------------------------------------------------- #
# References / init
# --------------------------------------------------------------------------- #
def init_linear_params(key, in_dim, out_dim):
    """Deterministic init mimicking torch.nn.Linear (uniform +-1/sqrt(in_dim))."""
    kw, kb = jax.random.split(key)
    bound = 1.0 / jnp.sqrt(jnp.float32(in_dim))
    w = jax.random.uniform(kw, (in_dim, out_dim), jnp.float32, -bound, bound)
    b = jax.random.uniform(kb, (1, out_dim), jnp.float32, -bound, bound)
    return w, b


def reference_forward_f32(state, return_to_go, timestep, params):
    """Exact module semantics, pure f32."""
    x = jnp.concatenate([state, return_to_go, timestep], axis=-1)
    w1, b1, w2, b2, w3, b3 = params
    h = _leaky_relu(x @ w1 + b1)
    h = _leaky_relu(h @ w2 + b2)
    return h @ w3 + b3


def reference_forward_bf16(state, return_to_go, timestep, prepped, out_dim):
    """Same math as the kernel (bf16 operands, f32 accumulation), in plain JAX."""
    w1s, w1r, w1t, b1, w2, b2, w3p, b3 = prepped
    h = jnp.dot(state.astype(jnp.bfloat16), w1s, preferred_element_type=jnp.float32)
    h = h + return_to_go * w1r + timestep * w1t
    h = _leaky_relu(h + b1)
    h = jnp.dot(h.astype(jnp.bfloat16), w2, preferred_element_type=jnp.float32)
    h = _leaky_relu(h + b2)
    y = jnp.dot(h.astype(jnp.bfloat16), w3p, preferred_element_type=jnp.float32)
    return y[:, :out_dim] + b3


# --------------------------------------------------------------------------- #
# Demo / correctness check
# --------------------------------------------------------------------------- #
if __name__ == "__main__":
    # Shapes consistent with the module's forward:
    #   state: (B, state_dim), return_to_go: (B, 1), timestep: (B, 1)
    #   input_dim = state_dim + 2
    batch = 256                 # -> tm=128, grid=2 (pipelined)
    state_dim = 30
    input_dim = state_dim + 2   # 32
    hidden_units = [256, 256]   # module default
    output_dim = 8

    key = jax.random.PRNGKey(0)
    k_state, k_rtg, k_t, k1, k2, k3 = jax.random.split(key, 6)

    state = jax.random.normal(k_state, (batch, state_dim), jnp.float32)
    return_to_go = jax.random.normal(k_rtg, (batch, 1), jnp.float32)
    timestep = jax.random.uniform(k_t, (batch, 1), jnp.float32, 0.0, 1.0)

    w1, b1 = init_linear_params(k1, input_dim, hidden_units[0])
    w2, b2 = init_linear_params(k2, hidden_units[0], hidden_units[1])
    w3, b3 = init_linear_params(k3, hidden_units[1], output_dim)
    params = (w1, b1, w2, b2, w3, b3)

    prepped, out_dim = prepare_params(params, state_dim)

    fwd = jax.jit(functools.partial(quantile_encoder_forward, out_dim=out_dim))
    out = fwd(state, return_to_go, timestep, prepped)
    out = jax.block_until_ready(out)
    assert out.shape == (batch, output_dim)

    # Exact-computation reference (bf16 operands, f32 accumulation).
    ref_bf16 = reference_forward_bf16(state, return_to_go, timestep, prepped, out_dim)
    assert jnp.allclose(out, ref_bf16, atol=5e-3, rtol=5e-3), \
        "Pallas output mismatch vs bf16-emulated reference"

    # Loose sanity check against the pure-f32 module semantics
    # (bf16 weight rounding keeps this within ~1% for these sizes).
    ref_f32 = reference_forward_f32(state, return_to_go, timestep, params)
    assert jnp.allclose(out, ref_f32, atol=1e-1, rtol=1e-1), \
        "Pallas output diverged from f32 reference"

    print("KERNEL_OK")
</pallas_src>

<mosaic_0001>
module attributes {stable_mosaic.version = 11 : i64} {
  func.func @quantile_encoder_kernel(%arg0: i32, %arg1: memref<128x30xf32, #tpu.memory_space<vmem>>, %arg2: memref<128x2xf32, #tpu.memory_space<vmem>>, %arg3: memref<30x256xbf16, #tpu.memory_space<vmem>>, %arg4: memref<1x256xf32, #tpu.memory_space<vmem>>, %arg5: memref<1x256xf32, #tpu.memory_space<vmem>>, %arg6: memref<1x256xf32, #tpu.memory_space<vmem>>, %arg7: memref<256x256xbf16, #tpu.memory_space<vmem>>, %arg8: memref<1x256xf32, #tpu.memory_space<vmem>>, %arg9: memref<256x128xbf16, #tpu.memory_space<vmem>>, %arg10: memref<1x8xf32, #tpu.memory_space<vmem>>, %arg11: memref<128x8xf32, #tpu.memory_space<vmem>>) attributes {dimension_semantics = [#tpu.dimension_semantics<parallel>], iteration_bounds = array<i64: 2>, scalar_prefetch = 0 : i64, scratch_operands = 0 : i64, tpu.core_type = #tpu.core_type<tc>, window_params = [{transform_indices = @transform_0, window_bounds = array<i64: 128, 30>}, {transform_indices = @transform_1, window_bounds = array<i64: 128, 2>}, {pipeline_mode = #tpu.pipeline_mode<synchronous>, transform_indices = @transform_2, window_bounds = array<i64: 30, 256>}, {pipeline_mode = #tpu.pipeline_mode<synchronous>, transform_indices = @transform_3, window_bounds = array<i64: 1, 256>}, {pipeline_mode = #tpu.pipeline_mode<synchronous>, transform_indices = @transform_4, window_bounds = array<i64: 1, 256>}, {pipeline_mode = #tpu.pipeline_mode<synchronous>, transform_indices = @transform_5, window_bounds = array<i64: 1, 256>}, {pipeline_mode = #tpu.pipeline_mode<synchronous>, transform_indices = @transform_6, window_bounds = array<i64: 256, 256>}, {pipeline_mode = #tpu.pipeline_mode<synchronous>, transform_indices = @transform_7, window_bounds = array<i64: 1, 256>}, {pipeline_mode = #tpu.pipeline_mode<synchronous>, transform_indices = @transform_8, window_bounds = array<i64: 256, 128>}, {pipeline_mode = #tpu.pipeline_mode<synchronous>, transform_indices = @transform_9, window_bounds = array<i64: 1, 8>}, {transform_indices = @transform_10, window_bounds = array<i64: 128, 8>}]} {
    %c0 = arith.constant 0 : index
    %c0_0 = arith.constant 0 : index
    %0 = vector.load %arg2[%c0, %c0_0] : memref<128x2xf32, #tpu.memory_space<vmem>>, vector<128x2xf32>
    %c0_1 = arith.constant 0 : index
    %c0_2 = arith.constant 0 : index
    %1 = vector.load %arg1[%c0_1, %c0_2] : memref<128x30xf32, #tpu.memory_space<vmem>>, vector<128x30xf32>
    %2 = arith.truncf %1 : vector<128x30xf32> to vector<128x30xbf16>
    %c0_3 = arith.constant 0 : index
    %c0_4 = arith.constant 0 : index
    %3 = vector.load %arg3[%c0_3, %c0_4] : memref<30x256xbf16, #tpu.memory_space<vmem>>, vector<30x256xbf16>
    %cst = arith.constant dense<0.000000e+00> : vector<128x256xf32>
    %4 = tpu.matmul %2, %3, %cst {dimension_numbers = #tpu.dot_dimension_numbers<[1], [0], [0], [1], [0, 0, 1, 1], [], []>} : vector<128x30xbf16>, vector<30x256xbf16>, vector<128x256xf32> -> vector<128x256xf32>
    %5 = vector.extract_strided_slice %0 {offsets = [0, 0], sizes = [128, 1], strides = [1, 1]} : vector<128x2xf32> to vector<128x1xf32>
    %c0_5 = arith.constant 0 : index
    %c0_6 = arith.constant 0 : index
    %6 = vector.load %arg4[%c0_5, %c0_6] : memref<1x256xf32, #tpu.memory_space<vmem>>, vector<1x256xf32>
    %7 = vector.broadcast %5 : vector<128x1xf32> to vector<128x256xf32>
    %8 = vector.broadcast %6 : vector<1x256xf32> to vector<128x256xf32>
    %9 = arith.mulf %7, %8 : vector<128x256xf32>
    %10 = arith.addf %4, %9 : vector<128x256xf32>
    %11 = vector.extract_strided_slice %0 {offsets = [0, 1], sizes = [128, 1], strides = [1, 1]} : vector<128x2xf32> to vector<128x1xf32>
    %c0_7 = arith.constant 0 : index
    %c0_8 = arith.constant 0 : index
    %12 = vector.load %arg5[%c0_7, %c0_8] : memref<1x256xf32, #tpu.memory_space<vmem>>, vector<1x256xf32>
    %13 = vector.broadcast %11 : vector<128x1xf32> to vector<128x256xf32>
    %14 = vector.broadcast %12 : vector<1x256xf32> to vector<128x256xf32>
    %15 = arith.mulf %13, %14 : vector<128x256xf32>
    %16 = arith.addf %10, %15 : vector<128x256xf32>
    %c0_9 = arith.constant 0 : index
    %c0_10 = arith.constant 0 : index
    %17 = vector.load %arg6[%c0_9, %c0_10] : memref<1x256xf32, #tpu.memory_space<vmem>>, vector<1x256xf32>
    %18 = vector.broadcast %17 : vector<1x256xf32> to vector<128x256xf32>
    %19 = arith.addf %16, %18 : vector<128x256xf32>
    %cst_11 = arith.constant 0.000000e+00 : f32
    %20 = vector.broadcast %cst_11 : f32 to vector<128x256xf32>
    %21 = arith.cmpf ogt, %19, %20 : vector<128x256xf32>
    %cst_12 = arith.constant 0.00999999977 : f32
    %22 = vector.broadcast %cst_12 : f32 to vector<128x256xf32>
    %23 = arith.mulf %22, %19 : vector<128x256xf32>
    %24 = arith.select %21, %19, %23 : vector<128x256xi1>, vector<128x256xf32>
    %25 = arith.truncf %24 : vector<128x256xf32> to vector<128x256xbf16>
    %c0_13 = arith.constant 0 : index
    %c0_14 = arith.constant 0 : index
    %26 = vector.load %arg7[%c0_13, %c0_14] : memref<256x256xbf16, #tpu.memory_space<vmem>>, vector<256x256xbf16>
    %cst_15 = arith.constant dense<0.000000e+00> : vector<128x256xf32>
    %27 = tpu.matmul %25, %26, %cst_15 {dimension_numbers = #tpu.dot_dimension_numbers<[1], [0], [0], [1], [0, 0, 1, 1], [], []>} : vector<128x256xbf16>, vector<256x256xbf16>, vector<128x256xf32> -> vector<128x256xf32>
    %c0_16 = arith.constant 0 : index
    %c0_17 = arith.constant 0 : index
    %28 = vector.load %arg8[%c0_16, %c0_17] : memref<1x256xf32, #tpu.memory_space<vmem>>, vector<1x256xf32>
    %29 = vector.broadcast %28 : vector<1x256xf32> to vector<128x256xf32>
    %30 = arith.addf %27, %29 : vector<128x256xf32>
    %cst_18 = arith.constant 0.000000e+00 : f32
    %31 = vector.broadcast %cst_18 : f32 to vector<128x256xf32>
    %32 = arith.cmpf ogt, %30, %31 : vector<128x256xf32>
    %cst_19 = arith.constant 0.00999999977 : f32
    %33 = vector.broadcast %cst_19 : f32 to vector<128x256xf32>
    %34 = arith.mulf %33, %30 : vector<128x256xf32>
    %35 = arith.select %32, %30, %34 : vector<128x256xi1>, vector<128x256xf32>
    %36 = arith.truncf %35 : vector<128x256xf32> to vector<128x256xbf16>
    %c0_20 = arith.constant 0 : index
    %c0_21 = arith.constant 0 : index
    %37 = vector.load %arg9[%c0_20, %c0_21] : memref<256x128xbf16, #tpu.memory_space<vmem>>, vector<256x128xbf16>
    %cst_22 = arith.constant dense<0.000000e+00> : vector<128x128xf32>
    %38 = tpu.matmul %36, %37, %cst_22 {dimension_numbers = #tpu.dot_dimension_numbers<[1], [0], [0], [1], [0, 0, 1, 1], [], []>} : vector<128x256xbf16>, vector<256x128xbf16>, vector<128x128xf32> -> vector<128x128xf32>
    %39 = vector.extract_strided_slice %38 {offsets = [0, 0], sizes = [128, 8], strides = [1, 1]} : vector<128x128xf32> to vector<128x8xf32>
    %c0_23 = arith.constant 0 : index
    %c0_24 = arith.constant 0 : index
    %40 = vector.load %arg10[%c0_23, %c0_24] : memref<1x8xf32, #tpu.memory_space<vmem>>, vector<1x8xf32>
    %41 = vector.broadcast %40 : vector<1x8xf32> to vector<128x8xf32>
    %42 = arith.addf %39, %41 : vector<128x8xf32>
    %c0_25 = arith.constant 0 : index
    %c0_26 = arith.constant 0 : index
    %43 = vector.load %arg11[%c0_25, %c0_26] : memref<128x8xf32, #tpu.memory_space<vmem>>, vector<128x8xf32>
    tpu.vector_store %arg11[%c0_25, %c0_26], %42 {strides = array<i32>} : memref<128x8xf32, #tpu.memory_space<vmem>>, vector<128x8xf32>,
    return
  }
  func.func @transform_0(%arg0: i32) -> (i32, i32) {
    %c0_i32 = arith.constant 0 : i32
    %c0_i32_0 = arith.constant 0 : i32
    return %arg0, %c0_i32 : i32, i32
  }
  func.func @transform_1(%arg0: i32) -> (i32, i32) {
    %c0_i32 = arith.constant 0 : i32
    %c0_i32_0 = arith.constant 0 : i32
    return %arg0, %c0_i32 : i32, i32
  }
  func.func @transform_2(%arg0: i32) -> (i32, i32) {
    %c0_i32 = arith.constant 0 : i32
    %c0_i32_0 = arith.constant 0 : i32
    %c0_i32_1 = arith.constant 0 : i32
    return %c0_i32, %c0_i32_0 : i32, i32
  }
  func.func @transform_3(%arg0: i32) -> (i32, i32) {
    %c0_i32 = arith.constant 0 : i32
    %c0_i32_0 = arith.constant 0 : i32
    %c0_i32_1 = arith.constant 0 : i32
    return %c0_i32, %c0_i32_0 : i32, i32
  }
  func.func @transform_4(%arg0: i32) -> (i32, i32) {
    %c0_i32 = arith.constant 0 : i32
    %c0_i32_0 = arith.constant 0 : i32
    %c0_i32_1 = arith.constant 0 : i32
    return %c0_i32, %c0_i32_0 : i32, i32
  }
  func.func @transform_5(%arg0: i32) -> (i32, i32) {
    %c0_i32 = arith.constant 0 : i32
    %c0_i32_0 = arith.constant 0 : i32
    %c0_i32_1 = arith.constant 0 : i32
    return %c0_i32, %c0_i32_0 : i32, i32
  }
  func.func @transform_6(%arg0: i32) -> (i32, i32) {
    %c0_i32 = arith.constant 0 : i32
    %c0_i32_0 = arith.constant 0 : i32
    %c0_i32_1 = arith.constant 0 : i32
    return %c0_i32, %c0_i32_0 : i32, i32
  }
  func.func @transform_7(%arg0: i32) -> (i32, i32) {
    %c0_i32 = arith.constant 0 : i32
    %c0_i32_0 = arith.constant 0 : i32
    %c0_i32_1 = arith.constant 0 : i32
    return %c0_i32, %c0_i32_0 : i32, i32
  }
  func.func @transform_8(%arg0: i32) -> (i32, i32) {
    %c0_i32 = arith.constant 0 : i32
    %c0_i32_0 = arith.constant 0 : i32
    %c0_i32_1 = arith.constant 0 : i32
    return %c0_i32, %c0_i32_0 : i32, i32
  }
  func.func @transform_9(%arg0: i32) -> (i32, i32) {
    %c0_i32 = arith.constant 0 : i32
    %c0_i32_0 = arith.constant 0 : i32
    %c0_i32_1 = arith.constant 0 : i32
    return %c0_i32, %c0_i32_0 : i32, i32
  }
  func.func @transform_10(%arg0: i32) -> (i32, i32) {
    %c0_i32 = arith.constant 0 : i32
    %c0_i32_0 = arith.constant 0 : i32
    return %arg0, %c0_i32 : i32, i32
  }
}

</mosaic_0001>

<bundles_post_ra>
// kernel: quantile_encoder_forward.1
= control target key start
LH: loop header
LB: loop body
LE: loop exit
PB: predicated region body
PF: predicated region fallthrough
CT: control target
= control target key end

     0   :  { %s2080_s13 = smov 0   ;;  %s2674_s0 = inlined_call_operand.vmem [shape: f32[256,30], index: 0, kind: input, shape index: {}]   ;;  %s2675_s1 = inlined_call_operand.vmem [shape: f32[256,2], index: 1, kind: input, shape index: {}]   ;;  %s2676_s2 = inlined_call_operand.vmem [shape: bf16[30,256], index: 2, kind: input, shape index: {}]   ;;  %s2677_s3 = inlined_call_operand.vmem [shape: f32[1,256], index: 3, kind: input, shape index: {}]   ;;  %s2678_s4 = inlined_call_operand.vmem [shape: f32[1,256], index: 4, kind: input, shape index: {}]   ;;  %s2679_s5 = inlined_call_operand.vmem [shape: f32[1,256], index: 5, kind: input, shape index: {}]   ;;  %s2680_s6 = inlined_call_operand.vmem [shape: bf16[256,256], index: 6, kind: input, shape index: {}]   ;;  %s2681_s7 = inlined_call_operand.vmem [shape: f32[1,256], index: 7, kind: input, shape index: {}]   ;;  %s2682_s8 = inlined_call_operand.vmem [shape: bf16[256,128], index: 8, kind: input, shape index: {}]   ;;  %s2683_s9 = inlined_call_operand.vmem [shape: f32[1,8], index: 9, kind: input, shape index: {}]   ;;  %s2684_s10 = inlined_call_operand.vmem [shape: f32[256,8], index: 10, kind: output, shape index: {}]  }
   0x1 LB: > { %s1775_s14 = sadd.s32 4294967295, %s2021_s13   ;;  %p1779_p0 = scmp.ge.s32.totalorder %s2021_s13, 1  ;;  %s2021_s13 = sphi %s2080_s13, %s20_s13  }
   0x2   : > { %p324_p1 = scmp.lt.s32.totalorder %s2021_s13, 3 }
   0x4   : > { %p325_p2 = pnand %p1779_p0, %p324_p1 }
   0x5   : > { %v1945_v0 = vld [vmem:[%s2676_s2 + $0x4] ss:$8 sps:$4 sm:$0xff] (!%p325_p2)   ;;  %vm597_vm0 = vcmask (!%p325_p2), 1046528   ;;  %v1947_v1 = vld [vmem:[%s2676_s2] ss:$8 sps:$4 sm:$0xff] (!%p325_p2)   ;;  %v2023_v2 = vmov (!%p325_p2), 0  }
   0x6   : > { %328 = sbr.rel (%p325_p2) target bundleno = 745 (0x2e9), region = 60  ;;  %636 = vmatprep.mubr.bf16.mxu0 (!%p325_p2), %v2023_v2  ;;  %s1780_s19 = sshll.u32 (!%p325_p2), %s1775_s14, 4  ;;  %1924 = vset.pattern.permute.xlu0 (!%p325_p2), %v2023_v2  ;;  %v1948_v3 = vld [vmem:[%s2676_s2 + $0x14] ss:$8 sps:$4 sm:$0x7f] (!%p325_p2)   ;;  %v2024_v6 = vmov (!%p325_p2), 1  }
   0x7   : > { %604 = vmatprep.subr.bf16.mxu0 (!%p325_p2), %v1945_v0  ;;  %v1950_v4 = vld [vmem:[%s2676_s2 + $0x10] ss:$8 sps:$4 sm:$0x7f] (!%p325_p2)   ;;  %p368_p3 = scmp.lt.s32.totalorder (!%p325_p2), %s1780_s19, 31  ;;  %1925 = vset.pattern.permute.xlu1 (!%p325_p2), %v2024_v6  ;;  %v1951_v7 = vld [vmem:[%s2680_s6 + $0x4] ss:$8 sps:$4 sm:$0xff] (!%p325_p2)  }
   0x8   : > { %605 = vmatpush1.bf16.msra.mxu0 (!%p325_p2), %v1947_v1  ;;  %v599_v5 = vsel (!%p325_p2), %vm597_vm0, %v1950_v4, 0  ;;  %v1953_v8 = vld [vmem:[%s2680_s6] ss:$8 sps:$4 sm:$0xff] (!%p325_p2)   ;;  %v1954_v9 = vld [vmem:[%s2680_s6 + $0x14] ss:$8 sps:$4 sm:$0xff] (!%p325_p2)   ;;  %1217 = vmatprep.subr.bf16.mxu1 (!%p325_p2), %v1951_v7  ;;  %vm572_vm1 = vcmask (!%p325_p2), 244736  }
   0x9   : > { %1790 = vmatprep.subr.msk.bf16.mxu0 (!%p325_p2), %vm597_vm0, %v1948_v3  ;;  %1218 = vmatpush1.bf16.msra.mxu1 (!%p325_p2), %v1953_v8  ;;  %v1956_v10 = vld [vmem:[%s2680_s6 + $0x10] ss:$8 sps:$4 sm:$0xff] (!%p325_p2)   ;;  %v1957_v11 = vld [vmem:[%s2680_s6 + $0x24] ss:$8 sps:$4 sm:$0xff] (!%p325_p2)   ;;  %v1959_v15 = vld [vmem:[%s2680_s6 + $0x20] ss:$8 sps:$4 sm:$0xff] (!%p325_p2)  }
   0xa   : > { %1219 = vmatprep.subr.bf16.mxu1 (!%p325_p2), %v1954_v9  ;;  %v1960_v16 = vld [vmem:[%s2680_s6 + $0x34] ss:$8 sps:$4 sm:$0xff] (!%p325_p2)   ;;  %v1962_v21 = vld [vmem:[%s2680_s6 + $0x30] ss:$8 sps:$4 sm:$0xff] (!%p325_p2)   ;;  %v1963_v25 = vld [vmem:[%s2680_s6 + $0x44] ss:$8 sps:$4 sm:$0xff] (!%p325_p2)  }
   0xb   : > { %v1965_v27 = vld [vmem:[%s2680_s6 + $0x40] ss:$8 sps:$4 sm:$0xff] (!%p325_p2)   ;;  %v1966_v29 = vld [vmem:[%s2680_s6 + $0x54] ss:$8 sps:$4 sm:$0xff] (!%p325_p2)   ;;  %v1968_v31 = vld [vmem:[%s2680_s6 + $0x50] ss:$8 sps:$4 sm:$0xff] (!%p325_p2)  }
   0xc   : > { %607 = vmatpush1.bf16.msra.mxu0 (!%p325_p2), %v599_v5  ;;  %v1969_v33 = vld [vmem:[%s2680_s6 + $0x64] ss:$8 sps:$4 sm:$0xff] (!%p325_p2)   ;;  %v1971_v34 = vld [vmem:[%s2680_s6 + $0x60] ss:$8 sps:$4 sm:$0xff] (!%p325_p2)   ;;  %v1972_v38 = vld [vmem:[%s2680_s6 + $0x74] ss:$8 sps:$4 sm:$0xff] (!%p325_p2)  }
   0xd   : > { %s2686_s19 = smov (!%p368_p3, %s1780_s19), 31  ;;  %1220 = vmatpush1.bf16.msra.mxu1 %v1956_v10  ;;  %v1974_v39 = vld [vmem:[%s2680_s6 + $0x70] ss:$8 sps:$4 sm:$0xff]   ;;  %v1975_v41 = vld [vmem:[%s2680_s6 + $0x84] ss:$8 sps:$4 sm:$0xff]  }
   0xe   : > { %s2112_s30 = sshll.u32 %s2686_s19, 3  ;;  %1221 = vmatprep.subr.bf16.mxu1 %v1957_v11  ;;  %v1977_v43 = vld [vmem:[%s2680_s6 + $0x80] ss:$8 sps:$4 sm:$0xff]   ;;  %v1978_v44 = vld [vmem:[%s2680_s6 + $0x94] ss:$8 sps:$4 sm:$0xff]  }
   0xf   : > { %s2121_s16 = scalar_lea.vmem %s2674_s0, %s2112_s30  ;;  %s2132_s21 = scalar_lea.vmem %s2675_s1, %s2112_s30  ;;  %v1980_v47 = vld [vmem:[%s2680_s6 + $0x90] ss:$8 sps:$4 sm:$0xff]   ;;  %v1981_v49 = vld [vmem:[%s2680_s6 + $0xa4] ss:$8 sps:$4 sm:$0xff]   ;;  %v1983_v51 = vld [vmem:[%s2680_s6 + $0xa0] ss:$8 sps:$4 sm:$0xff]  }
  0x10   : > { %v402_v12 = vld [vmem:[%s2121_s16] sm:$0xff]  ;;  %v403_v13 = vld [vmem:[%s2121_s16 + $0x8] sm:$0xff]  ;;  %v404_v17 = vld [vmem:[%s2121_s16 + $0x10] sm:$0xff]  ;;  %s2621_s15 = scalar_lea.vmem %s2684_s10, %s2112_s30 }
  0x11   : > { %v418_v14 = vpack.c.bf16 %v403_v13, %v402_v12  ;;  %v405_v18 = vld [vmem:[%s2121_s16 + $0x18] sm:$0xff]  ;;  %v386_v19 = vld [vmem:[%s2132_s21] sm:$0xff]  ;;  %v387_v20 = vld [vmem:[%s2132_s21 + $0x8] sm:$0xff]  ;;  %1222 = vmatpush1.bf16.msra.mxu1 %v1959_v15 }
  0x12   : > { %719 = vperm.xlu1 %1925, %v386_v19   ;;  %433 = vperm.xlu0 %1924, %v386_v19   ;;  %v419_v22 = vpack.c.bf16 %v405_v18, %v404_v17  ;;  %v406_v23 = vld [vmem:[%s2121_s16 + $0x20] sm:$0xff]  ;;  %v388_v24 = vld [vmem:[%s2132_s21 + $0x10] sm:$0xff]  ;;  %v389_v26 = vld [vmem:[%s2132_s21 + $0x18] sm:$0xff] }
  0x13   : > { %1791 = vmatmul.mubr.msk.bf16.vlgmr.msra.gmra.mrb[0].mxu0 %vm572_vm1, %v418_v14  ;;  %1223 = vmatprep.subr.bf16.mxu1 %v1960_v16  ;;  %v407_v28 = vld [vmem:[%s2121_s16 + $0x28] sm:$0xff]  ;;  %v408_v35 = vld [vmem:[%s2121_s16 + $0x30] sm:$0xff]  ;;  %v409_v36 = vld [vmem:[%s2121_s16 + $0x38] sm:$0xff] }
  0x14   : > { %646 = vmatprep.mubr.bf16.mxu0 %v2023_v2  ;;  %v391_v30 = vld [vmem:[%s2132_s21 + $0x28] sm:$0xff]  ;;  %v420_v32 = vpack.c.bf16 %v407_v28, %v406_v23  ;;  %v390_v37 = vld [vmem:[%s2132_s21 + $0x20] sm:$0xff]  ;;  %v392_v40 = vld [vmem:[%s2132_s21 + $0x30] sm:$0xff]  ;;  %v421_v42 = vpack.c.bf16 %v409_v36, %v408_v35 }
  0x15   : > { %1224 = vmatpush1.bf16.msra.mxu1 %v1962_v21  ;;  %v410_v45 = vld [vmem:[%s2121_s16 + $0x40] sm:$0xff]  ;;  %v411_v46 = vld [vmem:[%s2121_s16 + $0x48] sm:$0xff]  ;;  %v393_v52 = vld [vmem:[%s2132_s21 + $0x38] sm:$0xff] }
  0x16   : > { %723 = vperm.xlu1 %1925, %v387_v20   ;;  %438 = vperm.xlu0 %1924, %v387_v20   ;;  %v395_v48 = vld [vmem:[%s2132_s21 + $0x48] sm:$0xff]  ;;  %v422_v50 = vpack.c.bf16 %v411_v46, %v410_v45  ;;  %v1984_v53 = vld [vmem:[%s2680_s6 + $0xb4] ss:$8 sps:$4 sm:$0xff]   ;;  %v1986_v57 = vld [vmem:[%s2680_s6 + $0xb0] ss:$8 sps:$4 sm:$0xff]  }
  0x17   : > { %1225 = vmatprep.subr.bf16.mxu1 %v1963_v25  ;;  %v412_v54 = vld [vmem:[%s2121_s16 + $0x50] sm:$0xff]  ;;  %v413_v55 = vld [vmem:[%s2121_s16 + $0x58] sm:$0xff]  ;;  %v414_v59 = vld [vmem:[%s2121_s16 + $0x60] sm:$0xff] }
  0x18   : > { %v396_v56 = vld [vmem:[%s2132_s21 + $0x50] sm:$0xff]  ;;  %v423_v58 = vpack.c.bf16 %v413_v55, %v412_v54  ;;  %v415_v60 = vld [vmem:[%s2121_s16 + $0x68] sm:$0xff]  ;;  %v394_v61 = vld [vmem:[%s2132_s21 + $0x40] sm:$0xff] }
  0x19   : > { %1226 = vmatpush1.bf16.msra.mxu1 %v1965_v27  ;;  %v424_v62 = vpack.c.bf16 %v415_v60, %v414_v59  ;;  %v399_v63 = vld [vmem:[%s2132_s21 + $0x68] sm:$0xff]  ;;  %v400_v0 = vld [vmem:[%s2132_s21 + $0x70] sm:$0xff]  ;;  %v417_v3 = vld [vmem:[%s2121_s16 + $0x78] sm:$0xff] }
  0x1a   : > { %1926 = vset.pattern.permute.xlu1 %v2023_v2  ;;  %443 = vperm.xlu0 %1924, %v388_v24   ;;  %v416_v1 = vld [vmem:[%s2121_s16 + $0x70] sm:$0xff]  ;;  %v397_v5 = vld [vmem:[%s2132_s21 + $0x58] sm:$0xff]  ;;  %v398_v7 = vld [vmem:[%s2132_s21 + $0x60] sm:$0xff] }
  0x1b   : > { %1792 = vmatmul.mubr.msk.bf16.gmra.mrb[4].mxu0 %vm572_vm1, %v419_v22  ;;  %448 = vperm.xlu1 %1926, %v389_v26   ;;  %v425_v4 = vpack.c.bf16 %v417_v3, %v416_v1  ;;  %v401_v8 = vld [vmem:[%s2132_s21 + $0x78] sm:$0xff]  ;;  %v1987_v9 = vld [vmem:[%s2680_s6 + $0xc4] ss:$8 sps:$4 sm:$0xff]   ;;  %v1989_v10 = vld [vmem:[%s2680_s6 + $0xc0] ss:$8 sps:$4 sm:$0xff]  }
  0x1c   : > { %656 = vmatprep.mubr.bf16.mxu0 %v2023_v2  ;;  %1227 = vmatprep.subr.bf16.mxu1 %v1966_v29  ;;  %v1990_v11 = vld [vmem:[%s2680_s6 + $0xd4] ss:$8 sps:$4 sm:$0xff]   ;;  %v1992_v12 = vld [vmem:[%s2680_s6 + $0xd0] ss:$8 sps:$4 sm:$0xff]   ;;  %v1995_v13 = vld [vmem:[%s2680_s6 + $0xe0] ss:$8 sps:$4 sm:$0xff]  }
  0x1d   : > { %1228 = vmatpush1.bf16.msra.mxu1 %v1968_v31  ;;  %v1996_v14 = vld [vmem:[%s2680_s6 + $0xf4] ss:$8 sps:$4 sm:$0xff]   ;;  %v1999_v15 = vld [vmem:[%s2682_s8 + $0x40] sm:$0xff]   ;;  %v2001_v17 = vld [vmem:[%s2682_s8 + $0x48] sm:$0xff]  }
  0x1e   : > { %458 = vperm.xlu0 %1924, %v391_v30   ;;  %1229 = vmatprep.subr.bf16.mxu1 %v1969_v33  ;;  %v2000_v16 = vld [vmem:[%s2682_s8] sm:$0xff]   ;;  %v2002_v18 = vld [vmem:[%s2682_s8 + $0x8] sm:$0xff]   ;;  %v2003_v19 = vld [vmem:[%s2682_s8 + $0x50] sm:$0xff]  }
  0x1f   : > { %1927 = vset.pattern.permute.xlu1 %v2024_v6  ;;  %1850 = vmatprep.subr.bf16.mxu0 %v1999_v15  ;;  %v2004_v20 = vld [vmem:[%s2682_s8 + $0x10] sm:$0xff]   ;;  %v2005_v21 = vld [vmem:[%s2682_s8 + $0x58] sm:$0xff]   ;;  %v2009_v27 = vld [vmem:[%s2682_s8 + $0x68] sm:$0xff]  }
  0x20   : > { %731 = vperm.xlu1 %1927, %v389_v26   ;;  %1851 = vmatpush3.bf16.msra.mxu0 %v2000_v16  ;;  %v2006_v23 = vld [vmem:[%s2682_s8 + $0x18] sm:$0xff]   ;;  %v2008_v26 = vld [vmem:[%s2682_s8 + $0x20] sm:$0xff]   ;;  %v2010_v29 = vld [vmem:[%s2682_s8 + $0x28] sm:$0xff]  }
  0x21   : > { %1230 = vmatpush1.bf16.msra.mxu1 %v1971_v34  ;;  %1852 = vmatprep.subr.bf16.mxu0 %v2001_v17  ;;  %v2012_v31 = vld [vmem:[%s2682_s8 + $0x30] sm:$0xff]  }
  0x22   : > { %1929 = vset.pattern.permute.xlu0 %v2024_v6  ;;  %1231 = vmatprep.subr.bf16.mxu1 %v1972_v38  ;;  %v512_v38 = vlaneseq }
  0x23   : > { %1793 = vmatmul.mubr.msk.bf16.gmra.mrb[8].mxu0 %vm572_vm1, %v420_v32  ;;  %727 = vperm.xlu0 %1929, %v388_v24   ;;  %v2007_v24 = vld [vmem:[%s2682_s8 + $0x60] sm:$0xff]  }
  0x24   : > { %666 = vmatprep.mubr.bf16.mxu0 %v2023_v2  ;;  %1928 = vset.pattern.permute.xlu1 %v2023_v2 }
  0x25   : > { %453 = vperm.xlu1 %1928, %v390_v37   ;;  %1232 = vmatpush1.bf16.msra.mxu1 %v1974_v39  ;;  %v513_v39 = vshrl.u32 %v512_v38, 7 }
  0x26   : > { %1233 = vmatprep.subr.bf16.mxu1 %v1975_v41  ;;  %1853 = vmatpush3.bf16.msra.mxu0 %v2002_v18 }
  0x27   : > { %743 = vperm.xlu0 %1929, %v392_v40   ;;  %1854 = vmatprep.subr.bf16.mxu0 %v2003_v19 }
  0x29   : > { %1930 = vset.pattern.permute.xlu1 %v2024_v6  ;;  %1234 = vmatpush1.bf16.msra.mxu1 %v1977_v43  ;;  %v2325_v43 = vsub.s32 1, %v513_v39 }
  0x2a   : > { %735 = vperm.xlu1 %1930, %v390_v37   ;;  %1235 = vmatprep.subr.bf16.mxu1 %v1978_v44  ;;  %v717_v44 = vld [vmem:[%s2678_s4] sm:$0x3] }
  0x2b   : > { %1794 = vmatmul.mubr.msk.bf16.gmra.mrb[12].mxu0 %vm572_vm1, %v421_v42  ;;  %1932 = vset.pattern.permute.xlu0 %v2023_v2  ;;  %v2323_v42 = vsub.s32 0, %v513_v39 }
  0x2c   : > { %676 = vmatprep.mubr.bf16.mxu0 %v2023_v2  ;;  %463 = vperm.xlu0 %1932, %v392_v40  }
  0x2d   : > { %1236 = vmatpush1.bf16.msra.mxu1 %v1980_v47  ;;  %1855 = vmatpush3.bf16.msra.mxu0 %v2004_v20  ;;  %v430_v47 = vld [vmem:[%s2677_s3] sm:$0x3] }
  0x2e   : > { %739 = vperm.xlu1 %1930, %v391_v30   ;;  %1237 = vmatprep.subr.bf16.mxu1 %v1981_v49  ;;  %v2011_v30 = vld [vmem:[%s2682_s8 + $0x70] sm:$0xff]   ;;  %v2339_v49 = vrot.slane %v717_v44, %v2325_v43 }
  0x2f   : > { %1856 = vmatprep.subr.bf16.mxu0 %v2005_v21 }
  0x30   : > { %478 = vperm.xlu0 %1932, %v395_v48  }
  0x31   : > { %1238 = vmatpush1.bf16.msra.mxu1 %v1983_v51  ;;  %1857 = vmatpush3.bf16.msra.mxu0 %v2006_v23  ;;  %v2345_v51 = vrot.slane %v430_v47, %v2323_v42 }
  0x32   : > { %1931 = vset.pattern.permute.xlu1 %v2023_v2  ;;  %1239 = vmatprep.subr.bf16.mxu1 %v1984_v53 }
  0x33   : > { %1795 = vmatmul.mubr.msk.bf16.gmra.mrb[16].mxu0 %vm572_vm1, %v422_v50  ;;  %468 = vperm.xlu1 %1931, %v393_v52   ;;  %v857_v50 = vld [vmem:[%s2679_s5] sm:$0x3] }
  0x34   : > { %686 = vmatprep.mubr.bf16.mxu0 %v2023_v2  ;;  %483 = vperm.xlu0 %1932, %v396_v56   ;;  %v2351_v53 = vrot.slane %v857_v50, %v2323_v42  ;;  %v2359_v59 = vrot.slane %v857_v50, %v2325_v43 }
  0x35   : > { %1240 = vmatpush1.bf16.msra.mxu1 %v1986_v57  ;;  %1858 = vmatprep.subr.bf16.mxu0 %v2007_v24 }
  0x36   : > { %1241 = vmatprep.subr.bf16.mxu1 %v1987_v9  ;;  %1859 = vmatpush3.bf16.msra.mxu0 %v2008_v26 }
  0x37   : > { %1933 = vset.pattern.permute.xlu1 %v2024_v6  ;;  %1860 = vmatprep.subr.bf16.mxu0 %v2009_v27 }
  0x38   : > { %747 = vperm.xlu1 %1933, %v393_v52   ;;  %1937 = vset.pattern.permute.xlu0 %v2024_v6  ;;  %v2348_v52 = vrot.slane %v430_v47, %v2325_v43 }
  0x39   : > { %759 = vperm.xlu0 %1937, %v396_v56   ;;  %1242 = vmatpush1.bf16.msra.mxu1 %v1989_v10 }
  0x3a   : > { %1243 = vmatprep.subr.bf16.mxu1 %v1990_v11  ;;  %1861 = vmatpush3.bf16.msra.mxu0 %v2010_v29 }
  0x3b   : > { %1796 = vmatmul.mubr.msk.bf16.gmra.mrb[20].mxu0 %vm572_vm1, %v423_v58  ;;  %1862 = vmatprep.subr.bf16.mxu0 %v2011_v30 }
  0x3c   : > { %696 = vmatprep.mubr.bf16.mxu0 %v2023_v2  ;;  %1934 = vset.pattern.permute.xlu1 %v2023_v2 }
  0x3d   : > { %473 = vperm.xlu1 %1934, %v394_v61   ;;  %1940 = vset.pattern.permute.xlu0 %v2023_v2 }
  0x3e   : > { %498 = vperm.xlu0 %1940, %v399_v63   ;;  %1244 = vmatpush1.bf16.msra.mxu1 %v1992_v12 }
  0x3f   : > { %1863 = vmatpush3.bf16.msra.mxu0 %v2012_v31 }
  0x41   : > { %1935 = vset.pattern.permute.xlu1 %v2024_v6 }
  0x42   : > { %751 = vperm.xlu1 %1935, %v394_v61   ;;  %503 = vperm.xlu0 %1940, %v400_v0  }
  0x43   : > { %1797 = vmatmul.mubr.msk.bf16.gmra.mrb[24].mxu0 %vm572_vm1, %v424_v62 }
  0x44   : > { %706 = vmatprep.mubr.bf16.mxu0 %v2023_v2 }
  0x46   : > { %755 = vperm.xlu1 %1935, %v395_v48   ;;  %1943 = vset.pattern.permute.xlu0 %v2024_v6  ;;  %v2336_v48 = vrot.slane %v717_v44, %v2323_v42 }
  0x47   : > { %775 = vperm.xlu0 %1943, %v400_v0  }
  0x4a   : > { %1936 = vset.pattern.permute.xlu1 %v2023_v2 }
  0x4b   : > { %1798 = vmatmul.mubr.msk.bf16.gmra.mrb[28].mxu0 %vm572_vm1, %v425_v4  ;;  %488 = vperm.xlu1 %1936, %v397_v5  }
  0x4f   : > { %1938 = vset.pattern.permute.xlu1 %v2024_v6 }
  0x50   : > { %763 = vperm.xlu1 %1938, %v397_v5  }
  0x54   : > { %1939 = vset.pattern.permute.xlu1 %v2023_v2 }
  0x55   : > { %493 = vperm.xlu1 %1939, %v398_v7  }
  0x59   : > { %1941 = vset.pattern.permute.xlu1 %v2024_v6 }
  0x5a   : > { %767 = vperm.xlu1 %1941, %v398_v7  }
  0x5e   : > { %771 = vperm.xlu1 %1941, %v399_v63  }
  0x62   : > { %1942 = vset.pattern.permute.xlu1 %v2023_v2  ;;  %v1993_v2 = vld [vmem:[%s2680_s6 + $0xe4] ss:$8 sps:$4 sm:$0xff]  }
  0x63   : > { %508 = vperm.xlu1 %1942, %v401_v8   ;;  %1245 = vmatprep.subr.bf16.mxu1 %v1993_v2 }
  0x64   : > { %1246 = vmatpush1.bf16.msra.mxu1 %v1995_v13 }
  0x65   : > { %1247 = vmatprep.subr.bf16.mxu1 %v1996_v14 }
  0x67   : > { %1944 = vset.pattern.permute.xlu1 %v2024_v6  ;;  %v1998_v6 = vld [vmem:[%s2680_s6 + $0xf0] ss:$8 sps:$4 sm:$0xff]  }
  0x68   : > { %779 = vperm.xlu1 %1944, %v401_v8   ;;  %1248 = vmatpush1.bf16.msra.mxu1 %v1998_v6 }
  0x91   : > { %v720_v22 = vpop.permute.xlu1 %719  ;;  %v434_v32 = vpop.permute.xlu0 %433 }
  0x92   : > { %v793_v56 = vmul.f32 %v2336_v48, %v720_v22  ;;  %v794_v57 = vmul.f32 %v2339_v49, %v720_v22  ;;  %v522_v58 = vmul.f32 %v2345_v51, %v434_v32  ;;  %v523_v62 = vmul.f32 %v2348_v52, %v434_v32 }
  0x95   : > { %v724_v25 = vpop.permute.xlu1 %723  ;;  %v439_v34 = vpop.permute.xlu0 %438 }
  0x96   : > { %v795_v60 = vmul.f32 %v2336_v48, %v724_v25  ;;  %v796_v61 = vmul.f32 %v2339_v49, %v724_v25  ;;  %v524_v63 = vmul.f32 %v2345_v51, %v439_v34  ;;  %v525_v1 = vmul.f32 %v2348_v52, %v439_v34 }
  0x99   : > { %v444_v36 = vpop.permute.xlu0 %443 }
  0x9a   : > { %v449_v28 = vpop.permute.xlu1 %448  ;;  %v526_v3 = vmul.f32 %v2345_v51, %v444_v36  ;;  %v527_v4 = vmul.f32 %v2348_v52, %v444_v36 }
  0x9b   : > { %v528_v0 = vmul.f32 %v2345_v51, %v449_v28  ;;  %v529_v7 = vmul.f32 %v2348_v52, %v449_v28 }
  0x9d   : > { %v459_v40 = vpop.permute.xlu0 %458 }
  0x9e   : > { %v2371_v8 = vmul.f32 %v2345_v51, %v459_v40  ;;  %v2374_v9 = vmul.f32 %v2348_v52, %v459_v40 }
  0x9f   : > { %v732_v33 = vpop.permute.xlu1 %731 }
  0xa0   : > { %v799_v2 = vmul.f32 %v2336_v48, %v732_v33  ;;  %v800_v13 = vmul.f32 %v2339_v49, %v732_v33 }
  0xa2   : > { %v728_v46 = vpop.permute.xlu0 %727 }
  0xa3   : > { %v797_v15 = vmul.f32 %v2336_v48, %v728_v46  ;;  %v798_v20 = vmul.f32 %v2339_v49, %v728_v46 }
  0xa4   : > { %v454_v35 = vpop.permute.xlu1 %453 }
  0xa5   : > { %v2380_v16 = vmul.f32 %v2345_v51, %v454_v35  ;;  %v2386_v22 = vmul.f32 %v2348_v52, %v454_v35 }
  0xa6   : > { %v744_v55 = vpop.permute.xlu0 %743 }
  0xa7   : > { %v2389_v25 = vmul.f32 %v2336_v48, %v744_v55  ;;  %v2396_v29 = vmul.f32 %v2339_v49, %v744_v55 }
  0xa9   : > { %v736_v37 = vpop.permute.xlu1 %735 }
  0xaa   : > { %v2392_v26 = vmul.f32 %v2336_v48, %v736_v37  ;;  %v2399_v30 = vmul.f32 %v2339_v49, %v736_v37 }
  0xab   : > { %v464_v12 = vpop.permute.xlu0 %463 }
  0xac   : > { %v2403_v33 = vmul.f32 %v2345_v51, %v464_v12  ;;  %v2407_v36 = vmul.f32 %v2348_v52, %v464_v12 }
  0xad   : > { %v2321_v41 = vpop.permute.xlu1 %739 }
  0xae   : > { %v2411_v39 = vmul.f32 %v2336_v48, %v2321_v41  ;;  %v2416_v46 = vmul.f32 %v2339_v49, %v2321_v41 }
  0xaf   : > { %v479_v38 = vpop.permute.xlu0 %478 }
  0xb2   : > { %v2330_v45 = vpop.permute.xlu1 %468 }
  0xb7   : > { %v2353_v54 = vpop.permute.xlu1 %747 }
  0xbc   : > { %v2383_v21 = vpop.permute.xlu1 %473 }
  0xe6   : > { %v638_v5 = vpop.f32.mrb[0].mxu0 }
  0xe7   : > { %v639_v10 = vadd.f32 %v638_v5, %v522_v58  ;;  %v640_v11 = vpop.f32.mrb[1].mxu0 }
  0xe8   : > { %v641_v14 = vadd.f32 %v640_v11, %v523_v62  ;;  %v642_v6 = vpop.f32.mrb[2].mxu0 }
  0xe9   : > { %v825_v17 = vadd.f32 %v793_v56, %v639_v10  ;;  %v643_v18 = vadd.f32 %v642_v6, %v524_v63  ;;  %v644_v19 = vpop.f32.mrb[3].mxu0  ;;  %v2418_v56 = vpop.permute.xlu1 %751 }
  0xea   : > { %v826_v23 = vadd.f32 %v794_v57, %v641_v14  ;;  %v645_v24 = vadd.f32 %v644_v19, %v525_v1 }
  0xeb   : > { %v869_v27 = vadd.f32 %v2351_v53, %v825_v17  ;;  %v827_v28 = vadd.f32 %v795_v60, %v643_v18  ;;  %v484_v18 = vpop.permute.xlu0 %483 }
  0xec   : > { %v870_v31 = vadd.f32 %v2359_v59, %v826_v23  ;;  %v828_v32 = vadd.f32 %v796_v61, %v645_v24 }
  0xed   : > { %v933_v34 = vmul.f32 0.01, %v869_v27  ;;  %v871_v35 = vadd.f32 %v2351_v53, %v827_v28  ;;  %vm901_vm2 = vcmp.gt.f32.partialorder %v869_v27, 0.0  ;;  %v2439_v24 = vpop.permute.xlu1 %755 }
  0xee   : > { %v872_v37 = vadd.f32 %v2359_v59, %v828_v32  ;;  %v648_v40 = vpop.f32.mrb[4].mxu0  ;;  %vm902_vm3 = vcmp.gt.f32.partialorder %v870_v31, 0.0  ;;  %v934_v44 = vmul.f32 0.01, %v870_v31 }
  0xef   : > { %v935_v47 = vmul.f32 0.01, %v871_v35  ;;  %v649_v50 = vadd.f32 %v648_v40, %v526_v3  ;;  %v650_v55 = vpop.f32.mrb[5].mxu0  ;;  %vm903_vm4 = vcmp.gt.f32.partialorder %v871_v35, 0.0  ;;  %v965_v61 = vsel %vm901_vm2, %v869_v27, %v933_v34 }
  0xf0   : > { %v651_v57 = vadd.f32 %v650_v55, %v527_v4  ;;  %v652_v58 = vpop.f32.mrb[6].mxu0  ;;  %vm904_vm5 = vcmp.gt.f32.partialorder %v872_v37, 0.0  ;;  %v936_v60 = vmul.f32 0.01, %v872_v37  ;;  %v966_v5 = vsel %vm902_vm3, %v870_v31, %v934_v44 }
  0xf1   : > { %v829_v62 = vadd.f32 %v797_v15, %v649_v50  ;;  %v653_v63 = vadd.f32 %v652_v58, %v528_v0  ;;  %v654_v1 = vpop.f32.mrb[7].mxu0  ;;  %v967_v10 = vsel %vm903_vm4, %v871_v35, %v935_v47  ;;  %v2424_v4 = vmul.f32 %v2345_v51, %v479_v38  ;;  %v760_v47 = vpop.permute.xlu0 %759 }
  0xf2   : > { %v830_v41 = vadd.f32 %v798_v20, %v651_v57  ;;  %v655_v11 = vadd.f32 %v654_v1, %v529_v7  ;;  %v968_v12 = vsel %vm904_vm5, %v872_v37, %v936_v60  ;;  %v997_v3 = vpack.c.bf16 %v967_v10, %v965_v61  ;;  %v2454_v60 = vpop.permute.xlu1 %488 }
  0xf3   : > { %v873_v14 = vadd.f32 %v2351_v53, %v829_v62  ;;  %v831_v6 = vadd.f32 %v799_v2, %v653_v63  ;;  %v998_v17 = vpack.c.bf16 %v968_v12, %v966_v5  ;;  %v2428_v15 = vmul.f32 %v2345_v51, %v2330_v45 }
  0xf4   : > { %v874_v0 = vadd.f32 %v2359_v59, %v830_v41  ;;  %v832_v19 = vadd.f32 %v800_v13, %v655_v11  ;;  %v2432_v20 = vmul.f32 %v2348_v52, %v479_v38  ;;  %v2436_v7 = vmul.f32 %v2348_v52, %v2330_v45 }
  0xf5   : > { %v937_v2 = vmul.f32 0.01, %v873_v14  ;;  %v875_v23 = vadd.f32 %v2351_v53, %v831_v6  ;;  %1249 = vmatprep.mubr.bf16.mxu1 %v998_v17  ;;  %vm905_vm6 = vcmp.gt.f32.partialorder %v873_v14, 0.0  ;;  %v2443_v13 = vmul.f32 %v2345_v51, %v484_v18 }
  0xf6   : > { %v938_v27 = vmul.f32 0.01, %v874_v0  ;;  %v876_v28 = vadd.f32 %v2359_v59, %v832_v19  ;;  %v658_v31 = vpop.f32.mrb[8].mxu0  ;;  %1250 = vmatmul.mubr.bf16.vlgmr.msra.gmra.mrb[0].mxu1 %v997_v3  ;;  %vm906_vm7 = vcmp.gt.f32.partialorder %v874_v0, 0.0  ;;  %v2447_v35 = vmul.f32 %v2348_v52, %v484_v18  ;;  %v2479_v19 = vpop.permute.xlu1 %763 }
  0xf7   : > { %v939_v32 = vmul.f32 0.01, %v875_v23  ;;  %v659_v45 = vadd.f32 %v658_v31, %v2380_v16  ;;  %v660_v34 = vpop.f32.mrb[9].mxu0  ;;  %vm907_vm8 = vcmp.gt.f32.partialorder %v875_v23, 0.0  ;;  %v969_v44 = vsel %vm905_vm6, %v873_v14, %v937_v2 }
  0xf8   : > { %v940_v38 = vmul.f32 0.01, %v876_v28  ;;  %v661_v37 = vadd.f32 %v660_v34, %v2386_v22  ;;  %v662_v40 = vpop.f32.mrb[10].mxu0  ;;  %vm908_vm9 = vcmp.gt.f32.partialorder %v876_v28, 0.0  ;;  %v970_v16 = vsel %vm906_vm7, %v874_v0, %v938_v27 }
  0xf9   : > { %v833_v50 = vadd.f32 %v2392_v26, %v659_v45  ;;  %v663_v55 = vadd.f32 %v662_v40, %v2371_v8  ;;  %v664_v57 = vpop.f32.mrb[11].mxu0  ;;  %v971_v58 = vsel %vm907_vm8, %v875_v23, %v939_v32  ;;  %v807_v1 = vmul.f32 %v2336_v48, %v2353_v54 }
  0xfa   : > { %v834_v61 = vadd.f32 %v2399_v30, %v661_v37  ;;  %v665_v62 = vadd.f32 %v664_v57, %v2374_v9  ;;  %v972_v22 = vsel %vm908_vm9, %v876_v28, %v940_v38  ;;  %v999_v63 = vpack.c.bf16 %v971_v58, %v969_v44  ;;  %v499_v44 = vpop.permute.xlu0 %498 }
  0xfb   : > { %v877_v5 = vadd.f32 %v2351_v53, %v833_v50  ;;  %v835_v26 = vadd.f32 %v2411_v39, %v663_v55  ;;  %v1000_v8 = vpack.c.bf16 %v972_v22, %v970_v16  ;;  %v808_v10 = vmul.f32 %v2339_v49, %v2353_v54 }
  0xfc   : > { %v878_v41 = vadd.f32 %v2359_v59, %v834_v61  ;;  %v836_v11 = vadd.f32 %v2416_v46, %v665_v62  ;;  %v2467_v30 = vmul.f32 %v2336_v48, %v760_v47  ;;  %v2471_v3 = vmul.f32 %v2339_v49, %v760_v47  ;;  %v2500_v61 = vpop.permute.xlu1 %493 }
  0xfd   : > { %v941_v9 = vmul.f32 0.01, %v877_v5  ;;  %v879_v12 = vadd.f32 %v2351_v53, %v835_v26  ;;  %1259 = vmatprep.mubr.bf16.mxu1 %v1000_v8  ;;  %vm909_vm10 = vcmp.gt.f32.partialorder %v877_v5, 0.0  ;;  %v538_v39 = vmul.f32 %v2345_v51, %v2383_v21 }
  0xfe   : > { %v942_v14 = vmul.f32 0.01, %v878_v41  ;;  %v880_v54 = vadd.f32 %v2359_v59, %v836_v11  ;;  %v668_v6 = vpop.f32.mrb[12].mxu0  ;;  %1260 = vmatmul.mubr.bf16.gmra.mrb[4].mxu1 %v999_v63  ;;  %vm910_vm11 = vcmp.gt.f32.partialorder %v878_v41, 0.0  ;;  %v539_v46 = vmul.f32 %v2348_v52, %v2383_v21 }
  0xff   : > { %v943_v17 = vmul.f32 0.01, %v879_v12  ;;  %v669_v18 = vadd.f32 %v668_v6, %v2403_v33  ;;  %v670_v0 = vpop.f32.mrb[13].mxu0  ;;  %vm911_vm12 = vcmp.gt.f32.partialorder %v879_v12, 0.0  ;;  %v973_v28 = vsel %vm909_vm10, %v877_v5, %v941_v9 }
 0x100   : > { %v944_v2 = vmul.f32 0.01, %v880_v54  ;;  %v671_v23 = vadd.f32 %v670_v0, %v2407_v36  ;;  %v672_v27 = vpop.f32.mrb[14].mxu0  ;;  %vm912_vm13 = vcmp.gt.f32.partialorder %v880_v54, 0.0  ;;  %v974_v21 = vsel %vm910_vm11, %v878_v41, %v942_v14 }
 0x101   : > { %v837_v31 = vadd.f32 %v2389_v25, %v669_v18  ;;  %v673_v32 = vadd.f32 %v672_v27, %v2428_v15  ;;  %v674_v45 = vpop.f32.mrb[15].mxu0  ;;  %v975_v34 = vsel %vm911_vm12, %v879_v12, %v943_v17  ;;  %v2489_v55 = vmul.f32 %v2345_v51, %v499_v44  ;;  %v504_v12 = vpop.permute.xlu0 %503 }
 0x102   : > { %v838_v33 = vadd.f32 %v2396_v29, %v671_v23  ;;  %v675_v38 = vadd.f32 %v674_v45, %v2436_v7  ;;  %v976_v37 = vsel %vm912_vm13, %v880_v54, %v944_v2  ;;  %v1001_v40 = vpack.c.bf16 %v975_v34, %v973_v28  ;;  %v768_v28 = vpop.permute.xlu1 %767 }
 0x103   : > { %v881_v36 = vadd.f32 %v2351_v53, %v837_v31  ;;  %v839_v47 = vadd.f32 %v807_v1, %v673_v32  ;;  %v1002_v50 = vpack.c.bf16 %v976_v37, %v974_v21  ;;  %v809_v25 = vmul.f32 %v2336_v48, %v2418_v56 }
 0x104   : > { %v882_v15 = vadd.f32 %v2359_v59, %v838_v33  ;;  %v840_v57 = vadd.f32 %v808_v10, %v675_v38  ;;  %v2495_v29 = vmul.f32 %v2348_v52, %v499_v44  ;;  %v810_v7 = vmul.f32 %v2339_v49, %v2418_v56 }
 0x105   : > { %v945_v16 = vmul.f32 0.01, %v881_v36  ;;  %v883_v58 = vadd.f32 %v2351_v53, %v839_v47  ;;  %1269 = vmatprep.mubr.bf16.mxu1 %v1002_v50  ;;  %vm913_vm14 = vcmp.gt.f32.partialorder %v881_v36, 0.0  ;;  %v811_v62 = vmul.f32 %v2336_v48, %v2439_v24 }
 0x106   : > { %v946_v22 = vmul.f32 0.01, %v882_v15  ;;  %v884_v63 = vadd.f32 %v2359_v59, %v840_v57  ;;  %v678_v1 = vpop.f32.mrb[16].mxu0  ;;  %1270 = vmatmul.mubr.bf16.gmra.mrb[8].mxu1 %v1001_v40  ;;  %vm914_vm15 = vcmp.gt.f32.partialorder %v882_v15, 0.0  ;;  %v812_v5 = vmul.f32 %v2339_v49, %v2439_v24 }
 0x107   : > { %v947_v56 = vmul.f32 0.01, %v883_v58  ;;  %v679_v26 = vadd.f32 %v678_v1, %v538_v39  ;;  %v680_v8 = vpop.f32.mrb[17].mxu0  ;;  %vm915_vm0 = vcmp.gt.f32.partialorder %v883_v58, 0.0  ;;  %v977_v9 = vsel %vm913_vm14, %v881_v36, %v945_v16 }
 0x108   : > { %v948_v10 = vmul.f32 0.01, %v884_v63  ;;  %v681_v41 = vadd.f32 %v680_v8, %v539_v46  ;;  %v682_v11 = vpop.f32.mrb[18].mxu0  ;;  %vm916_vm1 = vcmp.gt.f32.partialorder %v884_v63, 0.0  ;;  %v978_v17 = vsel %vm914_vm15, %v882_v15, %v946_v22  ;;  %v772_v22 = vpop.permute.xlu1 %771 }
 0x109   : > { %v841_v14 = vadd.f32 %v809_v25, %v679_v26  ;;  %v683_v54 = vadd.f32 %v682_v11, %v2424_v4  ;;  %v684_v6 = vpop.f32.mrb[19].mxu0  ;;  %v979_v18 = vsel %vm915_vm0, %v883_v58, %v947_v56  ;;  %v2512_v31 = vmul.f32 %v2345_v51, %v504_v12 }
 0x10a   : > { %v842_v0 = vadd.f32 %v810_v7, %v681_v41  ;;  %v685_v24 = vadd.f32 %v684_v6, %v2432_v20  ;;  %v980_v2 = vsel %vm916_vm1, %v884_v63, %v948_v10  ;;  %v1003_v39 = vpack.c.bf16 %v979_v18, %v977_v9 }
 0x10b   : > { %v885_v23 = vadd.f32 %v2351_v53, %v841_v14  ;;  %v843_v27 = vadd.f32 %v811_v62, %v683_v54  ;;  %v1004_v46 = vpack.c.bf16 %v980_v2, %v978_v17  ;;  %v544_v32 = vmul.f32 %v2345_v51, %v2454_v60 }
 0x10c   : > { %v886_v4 = vadd.f32 %v2359_v59, %v842_v0  ;;  %v844_v45 = vadd.f32 %v812_v5, %v685_v24  ;;  %v2518_v21 = vmul.f32 %v2348_v52, %v504_v12  ;;  %v545_v20 = vmul.f32 %v2348_v52, %v2454_v60  ;;  %v509_v54 = vpop.permute.xlu1 %508 }
 0x10d   : > { %v949_v34 = vmul.f32 0.01, %v885_v23  ;;  %v887_v33 = vadd.f32 %v2351_v53, %v843_v27  ;;  %1279 = vmatprep.mubr.bf16.mxu1 %v1004_v46  ;;  %vm917_vm2 = vcmp.gt.f32.partialorder %v885_v23, 0.0  ;;  %v815_v38 = vmul.f32 %v2336_v48, %v2479_v19 }
 0x10e   : > { %v950_v37 = vmul.f32 0.01, %v886_v4  ;;  %v888_v40 = vadd.f32 %v2359_v59, %v844_v45  ;;  %v688_v44 = vpop.f32.mrb[20].mxu0  ;;  %1280 = vmatmul.mubr.bf16.gmra.mrb[12].mxu1 %v1003_v39  ;;  %vm918_vm3 = vcmp.gt.f32.partialorder %v886_v4, 0.0  ;;  %v816_v36 = vmul.f32 %v2339_v49, %v2479_v19 }
 0x10f   : > { %v951_v47 = vmul.f32 0.01, %v887_v33  ;;  %v689_v60 = vadd.f32 %v688_v44, %v2443_v13  ;;  %v690_v50 = vpop.f32.mrb[21].mxu0  ;;  %vm919_vm4 = vcmp.gt.f32.partialorder %v887_v33, 0.0  ;;  %v981_v7 = vsel %vm917_vm2, %v885_v23, %v949_v34 }
 0x110   : > { %v952_v25 = vmul.f32 0.01, %v888_v40  ;;  %v691_v15 = vadd.f32 %v690_v50, %v2447_v35  ;;  %v692_v57 = vpop.f32.mrb[22].mxu0  ;;  %vm920_vm5 = vcmp.gt.f32.partialorder %v888_v40, 0.0  ;;  %v982_v63 = vsel %vm918_vm3, %v886_v4, %v950_v37 }
 0x111   : > { %v845_v16 = vadd.f32 %v2467_v30, %v689_v60  ;;  %v693_v58 = vadd.f32 %v692_v57, %v544_v32  ;;  %v694_v62 = vpop.f32.mrb[23].mxu0  ;;  %v983_v1 = vsel %vm919_vm4, %v887_v33, %v951_v47  ;;  %v546_v26 = vmul.f32 %v2345_v51, %v2500_v61 }
 0x112   : > { %v846_v19 = vadd.f32 %v2471_v3, %v691_v15  ;;  %v695_v5 = vadd.f32 %v694_v62, %v545_v20  ;;  %v984_v13 = vsel %vm920_vm5, %v888_v40, %v952_v25  ;;  %v1005_v56 = vpack.c.bf16 %v983_v1, %v981_v7  ;;  %v780_v25 = vpop.permute.xlu1 %779 }
 0x113   : > { %v889_v35 = vadd.f32 %v2351_v53, %v845_v16  ;;  %v847_v8 = vadd.f32 %v815_v38, %v693_v58  ;;  %v1006_v10 = vpack.c.bf16 %v984_v13, %v982_v63  ;;  %v547_v30 = vmul.f32 %v2348_v52, %v2500_v61 }
 0x114   : > { %v817_v41 = vmul.f32 %v2336_v48, %v768_v28  ;;  %v890_v11 = vadd.f32 %v2359_v59, %v846_v19  ;;  %v848_v9 = vadd.f32 %v816_v36, %v695_v5  ;;  %v818_v3 = vmul.f32 %v2339_v49, %v768_v28  ;;  %v776_v28 = vpop.permute.xlu0 %775 }
 0x115   : > { %v953_v12 = vmul.f32 0.01, %v889_v35  ;;  %v891_v14 = vadd.f32 %v2351_v53, %v847_v8  ;;  %1289 = vmatprep.mubr.bf16.mxu1 %v1006_v10  ;;  %vm921_vm6 = vcmp.gt.f32.partialorder %v889_v35, 0.0  ;;  %v819_v18 = vmul.f32 %v2336_v48, %v772_v22 }
 0x116   : > { %v954_v6 = vmul.f32 0.01, %v890_v11  ;;  %v892_v17 = vadd.f32 %v2359_v59, %v848_v9  ;;  %v698_v0 = vpop.f32.mrb[24].mxu0  ;;  %1290 = vmatmul.mubr.bf16.gmra.mrb[16].mxu1 %v1005_v56  ;;  %vm922_vm7 = vcmp.gt.f32.partialorder %v890_v11, 0.0  ;;  %v820_v24 = vmul.f32 %v2339_v49, %v772_v22 }
 0x117   : > { %v955_v61 = vmul.f32 0.01, %v891_v14  ;;  %v699_v2 = vadd.f32 %v698_v0, %v546_v26  ;;  %v700_v39 = vpop.f32.mrb[25].mxu0  ;;  %vm923_vm8 = vcmp.gt.f32.partialorder %v891_v14, 0.0  ;;  %v985_v32 = vsel %vm921_vm6, %v889_v35, %v953_v12 }
 0x118   : > { %v956_v23 = vmul.f32 0.01, %v892_v17  ;;  %v701_v27 = vadd.f32 %v700_v39, %v547_v30  ;;  %v702_v46 = vpop.f32.mrb[26].mxu0  ;;  %vm924_vm9 = vcmp.gt.f32.partialorder %v892_v17, 0.0  ;;  %v986_v34 = vsel %vm922_vm7, %v890_v11, %v954_v6 }
 0x119   : > { %v849_v4 = vadd.f32 %v817_v41, %v699_v2  ;;  %v703_v45 = vadd.f32 %v702_v46, %v2489_v55  ;;  %v704_v20 = vpop.f32.mrb[27].mxu0  ;;  %v987_v33 = vsel %vm923_vm8, %v891_v14, %v955_v61  ;;  %v821_v50 = vmul.f32 %v2336_v48, %v776_v28 }
 0x11a   : > { %v850_v38 = vadd.f32 %v818_v3, %v701_v27  ;;  %v705_v37 = vadd.f32 %v704_v20, %v2495_v29  ;;  %v988_v40 = vsel %vm924_vm9, %v892_v17, %v956_v23  ;;  %v1007_v44 = vpack.c.bf16 %v987_v33, %v985_v32  ;;  %v1045_v32 = vld [vmem:[%s2681_s7] sm:$0x3] }
 0x11b   : > { %v893_v36 = vadd.f32 %v2351_v53, %v849_v4  ;;  %v851_v47 = vadd.f32 %v819_v18, %v703_v45  ;;  %v1008_v60 = vpack.c.bf16 %v988_v40, %v986_v34  ;;  %v552_v55 = vmul.f32 %v2345_v51, %v509_v54 }
 0x11c   : > { %v894_v15 = vadd.f32 %v2359_v59, %v850_v38  ;;  %v852_v57 = vadd.f32 %v820_v24, %v705_v37  ;;  %v822_v7 = vmul.f32 %v2339_v49, %v776_v28  ;;  %v553_v29 = vmul.f32 %v2348_v52, %v509_v54 }
 0x11d   : > { %v957_v16 = vmul.f32 0.01, %v893_v36  ;;  %v895_v58 = vadd.f32 %v2351_v53, %v851_v47  ;;  %1299 = vmatprep.mubr.bf16.mxu1 %v1008_v60  ;;  %vm925_vm10 = vcmp.gt.f32.partialorder %v893_v36, 0.0  ;;  %v823_v1 = vmul.f32 %v2336_v48, %v780_v25 }
 0x11e   : > { %v958_v62 = vmul.f32 0.01, %v894_v15  ;;  %v896_v22 = vadd.f32 %v2359_v59, %v852_v57  ;;  %v708_v63 = vpop.f32.mrb[28].mxu0  ;;  %1300 = vmatmul.mubr.bf16.gmra.mrb[20].mxu1 %v1007_v44  ;;  %vm926_vm11 = vcmp.gt.f32.partialorder %v894_v15, 0.0  ;;  %v824_v13 = vmul.f32 %v2339_v49, %v780_v25 }
 0x11f   : > { %v959_v19 = vmul.f32 0.01, %v895_v58  ;;  %v709_v51 = vadd.f32 %v708_v63, %v2512_v31  ;;  %v710_v5 = vpop.f32.mrb[29].mxu0  ;;  %vm927_vm12 = vcmp.gt.f32.partialorder %v895_v58, 0.0  ;;  %v989_v35 = vsel %vm925_vm10, %v893_v36, %v957_v16 }
 0x120   : > { %v960_v56 = vmul.f32 0.01, %v896_v22  ;;  %v711_v52 = vadd.f32 %v710_v5, %v2518_v21  ;;  %v712_v26 = vpop.f32.mrb[30].mxu0  ;;  %vm928_vm13 = vcmp.gt.f32.partialorder %v896_v22, 0.0  ;;  %v990_v41 = vsel %vm926_vm11, %v894_v15, %v958_v62 }
 0x121   : > { %v853_v8 = vadd.f32 %v821_v50, %v709_v51  ;;  %v713_v10 = vadd.f32 %v712_v26, %v552_v55  ;;  %v714_v30 = vpop.f32.mrb[31].mxu0  ;;  %v991_v48 = vsel %vm927_vm12, %v895_v58, %v959_v19  ;;  %v2575_v4 = vrot.slane %v1045_v32, %v2323_v42 }
 0x122   : > { %v854_v11 = vadd.f32 %v822_v7, %v711_v52  ;;  %v715_v9 = vadd.f32 %v714_v30, %v553_v29  ;;  %v992_v12 = vsel %vm928_vm13, %v896_v22, %v960_v56  ;;  %v1009_v31 = vpack.c.bf16 %v991_v48, %v989_v35 }
 0x123   : > { %v897_v3 = vadd.f32 %v2351_v53, %v853_v8  ;;  %v855_v49 = vadd.f32 %v823_v1, %v713_v10  ;;  %v1010_v14 = vpack.c.bf16 %v992_v12, %v990_v41  ;;  %v2578_v45 = vrot.slane %v1045_v32, %v2325_v43 }
 0x124   : > { %v898_v54 = vadd.f32 %v2359_v59, %v854_v11  ;;  %v856_v21 = vadd.f32 %v824_v13, %v715_v9 }
 0x125   : > { %v961_v6 = vmul.f32 0.01, %v897_v3  ;;  %v899_v17 = vadd.f32 %v2351_v53, %v855_v49  ;;  %1309 = vmatprep.mubr.bf16.mxu1 %v1010_v14  ;;  %vm929_vm14 = vcmp.gt.f32.partialorder %v897_v3, 0.0  ;;  %v2013_v53 = vld [vmem:[%s2682_s8 + $0x78] sm:$0xff]  }
 0x126   : > { %v962_v18 = vmul.f32 0.01, %v898_v54  ;;  %v900_v0 = vadd.f32 %v2359_v59, %v856_v21  ;;  %1310 = vmatmul.mubr.bf16.gmra.mrb[24].mxu1 %v1009_v31  ;;  %vm930_vm15 = vcmp.gt.f32.partialorder %v898_v54, 0.0  ;;  %v2014_v59 = vld [vmem:[%s2682_s8 + $0x38] sm:$0xff]   ;;  %1864 = vmatprep.subr.bf16.mxu0 %v2013_v53 }
 0x127   : > { %v963_v61 = vmul.f32 0.01, %v899_v17  ;;  %vm931_vm0 = vcmp.gt.f32.partialorder %v899_v17, 0.0  ;;  %v993_v2 = vsel %vm929_vm14, %v897_v3, %v961_v6  ;;  %1865 = vmatpush3.bf16.msra.mxu0 %v2014_v59 }
 0x128   : > { %v964_v24 = vmul.f32 0.01, %v900_v0  ;;  %vm932_vm1 = vcmp.gt.f32.partialorder %v900_v0, 0.0  ;;  %v994_v23 = vsel %vm930_vm15, %v898_v54, %v962_v18 }
 0x129   : > { %v995_v39 = vsel %vm931_vm0, %v899_v17, %v963_v61 }
 0x12a   : > { %v996_v27 = vsel %vm932_vm1, %v900_v0, %v964_v24  ;;  %v1011_v46 = vpack.c.bf16 %v995_v39, %v993_v2 }
 0x12b   : > { %v1012_v28 = vpack.c.bf16 %v996_v27, %v994_v23 }
 0x12d   : > { %1319 = vmatprep.mubr.bf16.mxu1 %v1012_v28 }
 0x12e   : > { %1320 = vmatmul.mubr.bf16.gmra.mrb[28].mxu1 %v1011_v46 }
 0x1c9   : > { %v1251_v20 = vpop.f32.mrb[0].mxu1 }
 0x1ca   : > { %v1252_v34 = vadd.f32 %v1251_v20, %v2575_v4  ;;  %v1253_v33 = vpop.f32.mrb[1].mxu1 }
 0x1cb   : > { %v1254_v38 = vadd.f32 %v1253_v33, %v2578_v45  ;;  %v1255_v37 = vpop.f32.mrb[2].mxu1 }
 0x1cc   : > { %v1362_v40 = vmul.f32 0.01, %v1252_v34  ;;  %v1256_v44 = vadd.f32 %v1255_v37, %v2575_v4  ;;  %v1257_v36 = vpop.f32.mrb[3].mxu1  ;;  %vm1330_vm2 = vcmp.gt.f32.partialorder %v1252_v34, 0.0 }
 0x1cd   : > { %v1363_v47 = vmul.f32 0.01, %v1254_v38  ;;  %v1258_v60 = vadd.f32 %v1257_v36, %v2578_v45  ;;  %vm1331_vm3 = vcmp.gt.f32.partialorder %v1254_v38, 0.0 }
 0x1ce   : > { %vm1332_vm4 = vcmp.gt.f32.partialorder %v1256_v44, 0.0  ;;  %v1364_v42 = vmul.f32 0.01, %v1256_v44  ;;  %v1394_v50 = vsel %vm1330_vm2, %v1252_v34, %v1362_v40 }
 0x1cf   : > { %vm1333_vm5 = vcmp.gt.f32.partialorder %v1258_v60, 0.0  ;;  %v1365_v43 = vmul.f32 0.01, %v1258_v60  ;;  %v1395_v55 = vsel %vm1331_vm3, %v1254_v38, %v1363_v47 }
 0x1d0   : > { %v1396_v25 = vsel %vm1332_vm4, %v1256_v44, %v1364_v42 }
 0x1d1   : > { %v1426_v15 = vpack.c.bf16 %v1396_v25, %v1394_v50  ;;  %v1261_v57 = vpop.f32.mrb[4].mxu1  ;;  %v1397_v7 = vsel %vm1333_vm5, %v1258_v60, %v1365_v43 }
 0x1d2   : > { %v1262_v16 = vadd.f32 %v1261_v57, %v2575_v4  ;;  %v1263_v58 = vpop.f32.mrb[5].mxu1  ;;  %v1427_v29 = vpack.c.bf16 %v1397_v7, %v1395_v55 }
 0x1d3   : > { %v1264_v62 = vadd.f32 %v1263_v58, %v2578_v45  ;;  %v1265_v22 = vpop.f32.mrb[6].mxu1 }
 0x1d4   : > { %v1366_v63 = vmul.f32 0.01, %v1262_v16  ;;  %v1266_v1 = vadd.f32 %v1265_v22, %v2575_v4  ;;  %v1267_v19 = vpop.f32.mrb[7].mxu1  ;;  %1602 = vmatprep.mubr.bf16.mxu0 %v1427_v29  ;;  %vm1334_vm6 = vcmp.gt.f32.partialorder %v1262_v16, 0.0 }
 0x1d5   : > { %v1367_v51 = vmul.f32 0.01, %v1264_v62  ;;  %v1268_v5 = vadd.f32 %v1267_v19, %v2578_v45  ;;  %1603 = vmatmul.mubr.bf16.vlgmr.msra.gmra.mrb[32].mxu0 %v1426_v15  ;;  %vm1335_vm7 = vcmp.gt.f32.partialorder %v1264_v62, 0.0 }
 0x1d6   : > { %vm1336_vm8 = vcmp.gt.f32.partialorder %v1266_v1, 0.0  ;;  %v1368_v13 = vmul.f32 0.01, %v1266_v1  ;;  %v1398_v52 = vsel %vm1334_vm6, %v1262_v16, %v1366_v63 }
 0x1d7   : > { %vm1337_vm9 = vcmp.gt.f32.partialorder %v1268_v5, 0.0  ;;  %v1369_v56 = vmul.f32 0.01, %v1268_v5  ;;  %v1399_v8 = vsel %vm1335_vm7, %v1264_v62, %v1367_v51 }
 0x1d8   : > { %v1400_v26 = vsel %vm1336_vm8, %v1266_v1, %v1368_v13 }
 0x1d9   : > { %v1271_v35 = vpop.f32.mrb[8].mxu1  ;;  %v1401_v10 = vsel %vm1337_vm9, %v1268_v5, %v1369_v56  ;;  %v1428_v30 = vpack.c.bf16 %v1400_v26, %v1398_v52 }
 0x1da   : > { %v1272_v41 = vadd.f32 %v1271_v35, %v2575_v4  ;;  %v1273_v48 = vpop.f32.mrb[9].mxu1  ;;  %v1429_v11 = vpack.c.bf16 %v1401_v10, %v1399_v8 }
 0x1db   : > { %v1274_v9 = vadd.f32 %v1273_v48, %v2578_v45  ;;  %v1275_v12 = vpop.f32.mrb[10].mxu1 }
 0x1dc   : > { %v1370_v31 = vmul.f32 0.01, %v1272_v41  ;;  %v1276_v3 = vadd.f32 %v1275_v12, %v2575_v4  ;;  %v1277_v49 = vpop.f32.mrb[11].mxu1  ;;  %1610 = vmatprep.mubr.bf16.mxu0 %v1429_v11  ;;  %vm1338_vm10 = vcmp.gt.f32.partialorder %v1272_v41, 0.0 }
 0x1dd   : > { %v1371_v14 = vmul.f32 0.01, %v1274_v9  ;;  %v1278_v54 = vadd.f32 %v1277_v49, %v2578_v45  ;;  %1611 = vmatmul.mubr.bf16.gmra.mrb[36].mxu0 %v1428_v30  ;;  %vm1339_vm11 = vcmp.gt.f32.partialorder %v1274_v9, 0.0 }
 0x1de   : > { %vm1340_vm12 = vcmp.gt.f32.partialorder %v1276_v3, 0.0  ;;  %v1372_v21 = vmul.f32 0.01, %v1276_v3  ;;  %v1402_v17 = vsel %vm1338_vm10, %v1272_v41, %v1370_v31 }
 0x1df   : > { %vm1341_vm13 = vcmp.gt.f32.partialorder %v1278_v54, 0.0  ;;  %v1373_v6 = vmul.f32 0.01, %v1278_v54  ;;  %v1403_v61 = vsel %vm1339_vm11, %v1274_v9, %v1371_v14 }
 0x1e0   : > { %v1404_v18 = vsel %vm1340_vm12, %v1276_v3, %v1372_v21 }
 0x1e1   : > { %v1281_v0 = vpop.f32.mrb[12].mxu1  ;;  %v1405_v24 = vsel %vm1341_vm13, %v1278_v54, %v1373_v6  ;;  %v1430_v2 = vpack.c.bf16 %v1404_v18, %v1402_v17 }
 0x1e2   : > { %v1282_v39 = vadd.f32 %v1281_v0, %v2575_v4  ;;  %v1283_v23 = vpop.f32.mrb[13].mxu1  ;;  %v1431_v27 = vpack.c.bf16 %v1405_v24, %v1403_v61 }
 0x1e3   : > { %v1284_v46 = vadd.f32 %v1283_v23, %v2578_v45  ;;  %v1285_v28 = vpop.f32.mrb[14].mxu1 }
 0x1e4   : > { %v1374_v53 = vmul.f32 0.01, %v1282_v39  ;;  %v1286_v59 = vadd.f32 %v1285_v28, %v2575_v4  ;;  %v1287_v32 = vpop.f32.mrb[15].mxu1  ;;  %1618 = vmatprep.mubr.bf16.mxu0 %v1431_v27  ;;  %vm1342_vm14 = vcmp.gt.f32.partialorder %v1282_v39, 0.0 }
 0x1e5   : > { %v1375_v20 = vmul.f32 0.01, %v1284_v46  ;;  %v1288_v34 = vadd.f32 %v1287_v32, %v2578_v45  ;;  %1619 = vmatmul.mubr.bf16.gmra.mrb[40].mxu0 %v1430_v2  ;;  %vm1343_vm15 = vcmp.gt.f32.partialorder %v1284_v46, 0.0 }
 0x1e6   : > { %vm1344_vm0 = vcmp.gt.f32.partialorder %v1286_v59, 0.0  ;;  %v1376_v33 = vmul.f32 0.01, %v1286_v59  ;;  %v1406_v37 = vsel %vm1342_vm14, %v1282_v39, %v1374_v53 }
 0x1e7   : > { %vm1345_vm1 = vcmp.gt.f32.partialorder %v1288_v34, 0.0  ;;  %v1377_v38 = vmul.f32 0.01, %v1288_v34  ;;  %v1407_v36 = vsel %vm1343_vm15, %v1284_v46, %v1375_v20 }
 0x1e8   : > { %v1408_v40 = vsel %vm1344_vm0, %v1286_v59, %v1376_v33 }
 0x1e9   : > { %v1291_v44 = vpop.f32.mrb[16].mxu1  ;;  %v1409_v47 = vsel %vm1345_vm1, %v1288_v34, %v1377_v38  ;;  %v1432_v60 = vpack.c.bf16 %v1408_v40, %v1406_v37 }
 0x1ea   : > { %v1292_v42 = vadd.f32 %v1291_v44, %v2575_v4  ;;  %v1293_v43 = vpop.f32.mrb[17].mxu1  ;;  %v1433_v50 = vpack.c.bf16 %v1409_v47, %v1407_v36 }
 0x1eb   : > { %v1294_v25 = vadd.f32 %v1293_v43, %v2578_v45  ;;  %v1295_v15 = vpop.f32.mrb[18].mxu1 }
 0x1ec   : > { %v1378_v57 = vmul.f32 0.01, %v1292_v42  ;;  %v1296_v55 = vadd.f32 %v1295_v15, %v2575_v4  ;;  %v1297_v7 = vpop.f32.mrb[19].mxu1  ;;  %1626 = vmatprep.mubr.bf16.mxu0 %v1433_v50  ;;  %vm1346_vm2 = vcmp.gt.f32.partialorder %v1292_v42, 0.0 }
 0x1ed   : > { %v1379_v16 = vmul.f32 0.01, %v1294_v25  ;;  %v1298_v58 = vadd.f32 %v1297_v7, %v2578_v45  ;;  %1627 = vmatmul.mubr.bf16.gmra.mrb[44].mxu0 %v1432_v60  ;;  %vm1347_vm3 = vcmp.gt.f32.partialorder %v1294_v25, 0.0 }
 0x1ee   : > { %vm1348_vm4 = vcmp.gt.f32.partialorder %v1296_v55, 0.0  ;;  %v1380_v29 = vmul.f32 0.01, %v1296_v55  ;;  %v1410_v22 = vsel %vm1346_vm2, %v1292_v42, %v1378_v57  ;;  %vm1690_vm2 = vcmask 64512  }
 0x1ef   : > { %vm1349_vm5 = vcmp.gt.f32.partialorder %v1298_v58, 0.0  ;;  %v1381_v62 = vmul.f32 0.01, %v1298_v58  ;;  %v1411_v19 = vsel %vm1347_vm3, %v1294_v25, %v1379_v16 }
 0x1f0   : > { %v1412_v63 = vsel %vm1348_vm4, %v1296_v55, %v1380_v29 }
 0x1f1   : > { %v1301_v1 = vpop.f32.mrb[20].mxu1  ;;  %v1413_v51 = vsel %vm1349_vm5, %v1298_v58, %v1381_v62  ;;  %v1434_v5 = vpack.c.bf16 %v1412_v63, %v1410_v22 }
 0x1f2   : > { %v1302_v13 = vadd.f32 %v1301_v1, %v2575_v4  ;;  %v1303_v56 = vpop.f32.mrb[21].mxu1  ;;  %v1435_v52 = vpack.c.bf16 %v1413_v51, %v1411_v19 }
 0x1f3   : > { %v1304_v26 = vadd.f32 %v1303_v56, %v2578_v45  ;;  %v1305_v35 = vpop.f32.mrb[22].mxu1 }
 0x1f4   : > { %v1382_v8 = vmul.f32 0.01, %v1302_v13  ;;  %v1306_v10 = vadd.f32 %v1305_v35, %v2575_v4  ;;  %v1307_v30 = vpop.f32.mrb[23].mxu1  ;;  %1634 = vmatprep.mubr.bf16.mxu0 %v1435_v52  ;;  %vm1350_vm6 = vcmp.gt.f32.partialorder %v1302_v13, 0.0 }
 0x1f5   : > { %v1383_v41 = vmul.f32 0.01, %v1304_v26  ;;  %v1308_v48 = vadd.f32 %v1307_v30, %v2578_v45  ;;  %1635 = vmatmul.mubr.bf16.gmra.mrb[48].mxu0 %v1434_v5  ;;  %vm1351_vm7 = vcmp.gt.f32.partialorder %v1304_v26, 0.0 }
 0x1f6   : > { %vm1352_vm8 = vcmp.gt.f32.partialorder %v1306_v10, 0.0  ;;  %v1384_v11 = vmul.f32 0.01, %v1306_v10  ;;  %v1414_v12 = vsel %vm1350_vm6, %v1302_v13, %v1382_v8 }
 0x1f7   : > { %vm1353_vm9 = vcmp.gt.f32.partialorder %v1308_v48, 0.0  ;;  %v1385_v9 = vmul.f32 0.01, %v1308_v48  ;;  %v1415_v49 = vsel %vm1351_vm7, %v1304_v26, %v1383_v41 }
 0x1f8   : > { %v1416_v31 = vsel %vm1352_vm8, %v1306_v10, %v1384_v11 }
 0x1f9   : > { %v1311_v3 = vpop.f32.mrb[24].mxu1  ;;  %v1417_v14 = vsel %vm1353_vm9, %v1308_v48, %v1385_v9  ;;  %v1436_v54 = vpack.c.bf16 %v1416_v31, %v1414_v12 }
 0x1fa   : > { %v1312_v21 = vadd.f32 %v1311_v3, %v2575_v4  ;;  %v1313_v6 = vpop.f32.mrb[25].mxu1  ;;  %v1437_v17 = vpack.c.bf16 %v1417_v14, %v1415_v49 }
 0x1fb   : > { %v1314_v18 = vadd.f32 %v1313_v6, %v2578_v45  ;;  %v1315_v0 = vpop.f32.mrb[26].mxu1 }
 0x1fc   : > { %v1386_v61 = vmul.f32 0.01, %v1312_v21  ;;  %v1316_v24 = vadd.f32 %v1315_v0, %v2575_v4  ;;  %v1317_v2 = vpop.f32.mrb[27].mxu1  ;;  %1642 = vmatprep.mubr.bf16.mxu0 %v1437_v17  ;;  %vm1354_vm10 = vcmp.gt.f32.partialorder %v1312_v21, 0.0 }
 0x1fd   : > { %v1387_v39 = vmul.f32 0.01, %v1314_v18  ;;  %v1318_v23 = vadd.f32 %v1317_v2, %v2578_v45  ;;  %1643 = vmatmul.mubr.bf16.gmra.mrb[52].mxu0 %v1436_v54  ;;  %vm1355_vm11 = vcmp.gt.f32.partialorder %v1314_v18, 0.0 }
 0x1fe   : > { %vm1356_vm12 = vcmp.gt.f32.partialorder %v1316_v24, 0.0  ;;  %v1388_v27 = vmul.f32 0.01, %v1316_v24  ;;  %v1418_v28 = vsel %vm1354_vm10, %v1312_v21, %v1386_v61 }
 0x1ff   : > { %vm1357_vm13 = vcmp.gt.f32.partialorder %v1318_v23, 0.0  ;;  %v1389_v46 = vmul.f32 0.01, %v1318_v23  ;;  %v1419_v32 = vsel %vm1355_vm11, %v1314_v18, %v1387_v39 }
 0x200   : > { %v1420_v53 = vsel %vm1356_vm12, %v1316_v24, %v1388_v27 }
 0x201   : > { %v1321_v59 = vpop.f32.mrb[28].mxu1  ;;  %v1421_v20 = vsel %vm1357_vm13, %v1318_v23, %v1389_v46  ;;  %v1438_v34 = vpack.c.bf16 %v1420_v53, %v1418_v28 }
 0x202   : > { %v1322_v33 = vadd.f32 %v1321_v59, %v2575_v4  ;;  %v1323_v38 = vpop.f32.mrb[29].mxu1  ;;  %v1439_v37 = vpack.c.bf16 %v1421_v20, %v1419_v32 }
 0x203   : > { %v1324_v40 = vadd.f32 %v1323_v38, %v2578_v45  ;;  %v1325_v44 = vpop.f32.mrb[30].mxu1 }
 0x204   : > { %v1390_v36 = vmul.f32 0.01, %v1322_v33  ;;  %v1326_v47 = vadd.f32 %v1325_v44, %v2575_v4  ;;  %v1327_v60 = vpop.f32.mrb[31].mxu1  ;;  %1650 = vmatprep.mubr.bf16.mxu0 %v1439_v37  ;;  %vm1358_vm14 = vcmp.gt.f32.partialorder %v1322_v33, 0.0 }
 0x205   : > { %v1391_v42 = vmul.f32 0.01, %v1324_v40  ;;  %v1328_v43 = vadd.f32 %v1327_v60, %v2578_v45  ;;  %1651 = vmatmul.mubr.bf16.gmra.mrb[56].mxu0 %v1438_v34  ;;  %vm1359_vm15 = vcmp.gt.f32.partialorder %v1324_v40, 0.0  ;;  %v2615_v45 = vld [vmem:[%s2683_s9] ss:$0 sm:$0xff] }
 0x206   : > { %vm1360_vm0 = vcmp.gt.f32.partialorder %v1326_v47, 0.0  ;;  %v1392_v50 = vmul.f32 0.01, %v1326_v47  ;;  %v1422_v15 = vsel %vm1358_vm14, %v1322_v33, %v1390_v36 }
 0x207   : > { %vm1361_vm1 = vcmp.gt.f32.partialorder %v1328_v43, 0.0  ;;  %v1393_v25 = vmul.f32 0.01, %v1328_v43  ;;  %v1423_v55 = vsel %vm1359_vm15, %v1324_v40, %v1391_v42 }
 0x208   : > { %v1424_v57 = vsel %vm1360_vm0, %v1326_v47, %v1392_v50 }
 0x209   : > { %v1425_v7 = vsel %vm1361_vm1, %v1328_v43, %v1393_v25  ;;  %v1440_v16 = vpack.c.bf16 %v1424_v57, %v1422_v15 }
 0x20a   : > { %v1441_v58 = vpack.c.bf16 %v1425_v7, %v1423_v55 }
 0x20c   : > { %1658 = vmatprep.mubr.bf16.mxu0 %v1441_v58 }
 0x20d   : > { %1659 = vmatmul.mubr.bf16.gmra.mrb[60].mxu0 %v1440_v16 }
 0x2a8   : > { %v1866_v4 = vpop.f32.mrb[32].mxu0 }
 0x2a9   : > { %v1867_v29 = vpop.f32.mrb[33].mxu0 }
 0x2aa   : > { %v1868_v62 = vadd.f32 %v1867_v29, %v1866_v4  ;;  %v1869_v22 = vpop.f32.mrb[34].mxu0 }
 0x2ab   : > { %v1870_v63 = vpop.f32.mrb[35].mxu0 }
 0x2ac   : > { %v1674_v1 = vadd.f32 %v1868_v62, %v2615_v45  ;;  %v1871_v19 = vadd.f32 %v1870_v63, %v1869_v22 }
 0x2ae   : > { %1691 = vst.msk [vmem:[%s2621_s15] sm:$0xff] %vm1690_vm2, %v1674_v1  ;;  %v1675_v51 = vadd.f32 %v1871_v19, %v2615_v45 }
 0x2b0   : > { %1692 = vst.msk [vmem:[%s2621_s15 + $0x8] sm:$0xff] %vm1690_vm2, %v1675_v51  ;;  %v1872_v5 = vpop.f32.mrb[36].mxu0 }
 0x2b1   : > { %v1873_v13 = vpop.f32.mrb[37].mxu0 }
 0x2b2   : > { %v1874_v56 = vadd.f32 %v1873_v13, %v1872_v5  ;;  %v1875_v52 = vpop.f32.mrb[38].mxu0 }
 0x2b3   : > { %v1876_v26 = vpop.f32.mrb[39].mxu0 }
 0x2b4   : > { %v1676_v35 = vadd.f32 %v1874_v56, %v2615_v45  ;;  %v1877_v8 = vadd.f32 %v1876_v26, %v1875_v52 }
 0x2b6   : > { %1693 = vst.msk [vmem:[%s2621_s15 + $0x10] sm:$0xff] %vm1690_vm2, %v1676_v35  ;;  %v1677_v10 = vadd.f32 %v1877_v8, %v2615_v45 }
 0x2b8   : > { %1694 = vst.msk [vmem:[%s2621_s15 + $0x18] sm:$0xff] %vm1690_vm2, %v1677_v10  ;;  %v1878_v30 = vpop.f32.mrb[40].mxu0 }
 0x2b9   : > { %v1879_v41 = vpop.f32.mrb[41].mxu0 }
 0x2ba   : > { %v1880_v48 = vadd.f32 %v1879_v41, %v1878_v30  ;;  %v1881_v11 = vpop.f32.mrb[42].mxu0 }
 0x2bb   : > { %v1882_v9 = vpop.f32.mrb[43].mxu0 }
 0x2bc   : > { %v1678_v12 = vadd.f32 %v1880_v48, %v2615_v45  ;;  %v1883_v31 = vadd.f32 %v1882_v9, %v1881_v11 }
 0x2be   : > { %1695 = vst.msk [vmem:[%s2621_s15 + $0x20] sm:$0xff] %vm1690_vm2, %v1678_v12  ;;  %v1679_v3 = vadd.f32 %v1883_v31, %v2615_v45 }
 0x2c0   : > { %1696 = vst.msk [vmem:[%s2621_s15 + $0x28] sm:$0xff] %vm1690_vm2, %v1679_v3  ;;  %v1884_v49 = vpop.f32.mrb[44].mxu0 }
 0x2c1   : > { %v1885_v14 = vpop.f32.mrb[45].mxu0 }
 0x2c2   : > { %v1886_v54 = vadd.f32 %v1885_v14, %v1884_v49  ;;  %v1887_v21 = vpop.f32.mrb[46].mxu0 }
 0x2c3   : > { %v1888_v6 = vpop.f32.mrb[47].mxu0 }
 0x2c4   : > { %v1680_v17 = vadd.f32 %v1886_v54, %v2615_v45  ;;  %v1889_v18 = vadd.f32 %v1888_v6, %v1887_v21 }
 0x2c6   : > { %1697 = vst.msk [vmem:[%s2621_s15 + $0x30] sm:$0xff] %vm1690_vm2, %v1680_v17  ;;  %v1681_v0 = vadd.f32 %v1889_v18, %v2615_v45 }
 0x2c8   : > { %1698 = vst.msk [vmem:[%s2621_s15 + $0x38] sm:$0xff] %vm1690_vm2, %v1681_v0  ;;  %v1890_v61 = vpop.f32.mrb[48].mxu0 }
 0x2c9   : > { %v1891_v24 = vpop.f32.mrb[49].mxu0 }
 0x2ca   : > { %v1892_v2 = vadd.f32 %v1891_v24, %v1890_v61  ;;  %v1893_v39 = vpop.f32.mrb[50].mxu0 }
 0x2cb   : > { %v1894_v23 = vpop.f32.mrb[51].mxu0 }
 0x2cc   : > { %v1682_v27 = vadd.f32 %v1892_v2, %v2615_v45  ;;  %v1895_v46 = vadd.f32 %v1894_v23, %v1893_v39 }
 0x2ce   : > { %1699 = vst.msk [vmem:[%s2621_s15 + $0x40] sm:$0xff] %vm1690_vm2, %v1682_v27  ;;  %v1683_v28 = vadd.f32 %v1895_v46, %v2615_v45 }
 0x2d0   : > { %1700 = vst.msk [vmem:[%s2621_s15 + $0x48] sm:$0xff] %vm1690_vm2, %v1683_v28  ;;  %v1896_v53 = vpop.f32.mrb[52].mxu0 }
 0x2d1   : > { %v1897_v59 = vpop.f32.mrb[53].mxu0 }
 0x2d2   : > { %v1898_v32 = vadd.f32 %v1897_v59, %v1896_v53  ;;  %v1899_v20 = vpop.f32.mrb[54].mxu0 }
 0x2d3   : > { %v1900_v34 = vpop.f32.mrb[55].mxu0 }
 0x2d4   : > { %v1684_v33 = vadd.f32 %v1898_v32, %v2615_v45  ;;  %v1901_v38 = vadd.f32 %v1900_v34, %v1899_v20 }
 0x2d6   : > { %1701 = vst.msk [vmem:[%s2621_s15 + $0x50] sm:$0xff] %vm1690_vm2, %v1684_v33  ;;  %v1685_v37 = vadd.f32 %v1901_v38, %v2615_v45 }
 0x2d8   : > { %1702 = vst.msk [vmem:[%s2621_s15 + $0x58] sm:$0xff] %vm1690_vm2, %v1685_v37  ;;  %v1902_v40 = vpop.f32.mrb[56].mxu0 }
 0x2d9   : > { %v1903_v44 = vpop.f32.mrb[57].mxu0 }
 0x2da   : > { %v1904_v36 = vadd.f32 %v1903_v44, %v1902_v40  ;;  %v1905_v47 = vpop.f32.mrb[58].mxu0 }
 0x2db   : > { %v1906_v60 = vpop.f32.mrb[59].mxu0 }
 0x2dc   : > { %v1686_v42 = vadd.f32 %v1904_v36, %v2615_v45  ;;  %v1907_v43 = vadd.f32 %v1906_v60, %v1905_v47 }
 0x2de   : > { %1703 = vst.msk [vmem:[%s2621_s15 + $0x60] sm:$0xff] %vm1690_vm2, %v1686_v42  ;;  %v1687_v50 = vadd.f32 %v1907_v43, %v2615_v45 }
 0x2e0   : > { %1704 = vst.msk [vmem:[%s2621_s15 + $0x68] sm:$0xff] %vm1690_vm2, %v1687_v50  ;;  %v1908_v25 = vpop.f32.mrb[60].mxu0 }
 0x2e1   : > { %v1909_v15 = vpop.f32.mrb[61].mxu0 }
 0x2e2   : > { %v1910_v57 = vadd.f32 %v1909_v15, %v1908_v25  ;;  %v1911_v55 = vpop.f32.mrb[62].mxu0 }
 0x2e3   : > { %v1912_v7 = vpop.f32.mrb[63].mxu0 }
 0x2e4   : > { %v1688_v16 = vadd.f32 %v1910_v57, %v2615_v45  ;;  %v1913_v58 = vadd.f32 %v1912_v7, %v1911_v55 }
 0x2e6   : > { %1705 = vst.msk [vmem:[%s2621_s15 + $0x70] sm:$0xff] %vm1690_vm2, %v1688_v16  ;;  %v1689_v4 = vadd.f32 %v1913_v58, %v2615_v45 }
 0x2e8   : > { %1706 = vst.msk [vmem:[%s2621_s15 + $0x78] sm:$0xff] %vm1690_vm2, %v1689_v4 }
 0x2e9 PF: > { %s20_s13 = sadd.s32 1, %s2021_s13  }
 0x2ea   : > { %p17_p4 = scmp.ge.s32.totalorder %s20_s13, 4  }
 0x2ec   :  { %19 = sbr.rel (!%p17_p4) target bundleno = 1 (0x1), region = 93 }

</bundles_post_ra>
